<compile_context>
chip_gen: v6e
topology: v6e:2x2x1
jax: 0.10.0
libtpu: 0.0.40
codegen_flags: <defaults>
</compile_context>

<pallas_src>
import functools

import jax
import jax.numpy as jnp
import numpy as np
from jax.experimental import pallas as pl
from jax.experimental.pallas import tpu as pltpu


def _round_up(x, m):
    return ((x + m - 1) // m) * m


def _pad_gate_cols(w, H, Hp):
    """Pad each of the 4 gate blocks along the last axis from width H to Hp."""
    if Hp == H:
        return w
    parts = jnp.split(w, 4, axis=-1)
    pad = [(0, 0)] * (w.ndim - 1) + [(0, Hp - H)]
    return jnp.concatenate([jnp.pad(p, pad) for p in parts], axis=-1)


def _lstm_kernel(maxlen_ref, gx_ref, len_ref, whh_ref, h_ref, c_ref, *, Tc, Hp):
    """One grid step == one (batch block, time chunk).

    maxlen_ref : SMEM (1,) int32     scalar-prefetch max(lengths)
    gx_ref     : VMEM (Tc, Bb, 4Hp)  precomputed x@W_ih^T + bias for this chunk
    len_ref    : VMEM (Bb, 1) int32  per-row lengths (resident, constant idx)
    whh_ref    : VMEM (Hp, 4Hp)      recurrent weights (resident)
    h_ref      : output (Bb, Hp) f32 -- doubles as the persistent h state
    c_ref      : scratch (Bb, Hp) f32 cell state
    """
    t_chunk = pl.program_id(1)

    @pl.when(t_chunk == 0)
    def _init():
        h_ref[...] = jnp.zeros_like(h_ref)
        c_ref[...] = jnp.zeros_like(c_ref)

    # Skip whole chunks once every sequence in this batch block is finished.
    @pl.when(t_chunk * Tc < maxlen_ref[0])
    def _compute():
        lengths = len_ref[...]          # (Bb, 1) int32, loaded once per chunk
        whh = whh_ref[...]              # (Hp, 4Hp), mxu_dtype
        t0 = t_chunk * Tc

        def step(tl, carry):
            h, c = carry
            # Serial critical path: only h @ W_hh^T (the x-projection was
            # precomputed). f32 accumulation on the MXU.
            gates = gx_ref[tl] + jnp.dot(h.astype(whh.dtype), whh,
                                         preferred_element_type=jnp.float32)
            # Lane-aligned gate slices (each block is Hp = k*128 lanes wide).
            i_g = jax.nn.sigmoid(gates[:, 0 * Hp:1 * Hp])
            f_g = jax.nn.sigmoid(gates[:, 1 * Hp:2 * Hp])
            g_g = jnp.tanh(gates[:, 2 * Hp:3 * Hp])
            o_g = jax.nn.sigmoid(gates[:, 3 * Hp:4 * Hp])

            c_new = f_g * c + i_g * g_g
            h_new = o_g * jnp.tanh(c_new)

            # packed-sequence semantics: only rows with t < length update.
            mask = (t0 + tl) < lengths                       # (Bb, 1) bool
            return jnp.where(mask, h_new, h), jnp.where(mask, c_new, c)

        h, c = jax.lax.fori_loop(0, Tc, step, (h_ref[...], c_ref[...]),
                                 unroll=True)
        h_ref[...] = h
        c_ref[...] = c


def lstm_pallas(gates_x, lengths_2d, max_len, w_hh_p, *, Tc, Bblk, Hp):
    """gates_x: (Tp, B, 4Hp); returns final hidden (B, Hp) f32."""
    Tp, B, G = gates_x.shape
    assert G == 4 * Hp and Tp % Tc == 0 and B % Bblk == 0
    assert Bblk == B or Bblk % 8 == 0

    grid = (B // Bblk, Tp // Tc)
    kernel = functools.partial(_lstm_kernel, Tc=Tc, Hp=Hp)

    grid_spec = pltpu.PrefetchScalarGridSpec(
        num_scalar_prefetch=1,            # max_len -> SMEM
        grid=grid,
        in_specs=[
            pl.BlockSpec((Tc, Bblk, G), lambda b, t, ml: (t, b, 0)),  # gates_x chunk
            pl.BlockSpec((Bblk, 1), lambda b, t, ml: (b, 0)),         # lengths (resident)
            pl.BlockSpec((Hp, G), lambda b, t, ml: (0, 0)),           # W_hh^T (resident)
        ],
        out_specs=pl.BlockSpec((Bblk, Hp), lambda b, t, ml: (b, 0)),  # h state / output
        scratch_shapes=[pltpu.VMEM((Bblk, Hp), jnp.float32)],         # c state
    )

    return pl.pallas_call(
        kernel,
        out_shape=jax.ShapeDtypeStruct((B, Hp), jnp.float32),
        grid_spec=grid_spec,
        compiler_params=pltpu.CompilerParams(
            dimension_semantics=("parallel", "arbitrary")),
    )(max_len, gates_x, lengths_2d, w_hh_p)


def init_params(key, vocab_size, embedding_dim, hidden_dim, output_dim, pad_index):
    ks = jax.random.split(key, 7)
    k = 1.0 / np.sqrt(hidden_dim)
    emb = jax.random.normal(ks[0], (vocab_size, embedding_dim), jnp.float32)
    emb = emb.at[pad_index].set(0.0)                 # padding_idx row is zero
    w_ih = jax.random.uniform(ks[1], (4 * hidden_dim, embedding_dim), jnp.float32, -k, k)
    w_hh = jax.random.uniform(ks[2], (4 * hidden_dim, hidden_dim), jnp.float32, -k, k)
    b_ih = jax.random.uniform(ks[3], (4 * hidden_dim,), jnp.float32, -k, k)
    b_hh = jax.random.uniform(ks[4], (4 * hidden_dim,), jnp.float32, -k, k)
    w_fc = jax.random.uniform(ks[5], (output_dim, hidden_dim), jnp.float32, -k, k)
    b_fc = jax.random.uniform(ks[6], (output_dim,), jnp.float32, -k, k)
    return dict(emb=emb, w_ih=w_ih, w_hh=w_hh, b_ih=b_ih, b_hh=b_hh,
                w_fc=w_fc, b_fc=b_fc)


def forward(params, ids, lengths, *, time_chunk=8, batch_block=None,
            mxu_dtype=jnp.float32):
    """ids: (B, T) int32; lengths: (B,) int32  -> prediction (B, O)."""
    B, T = ids.shape
    H = params["w_hh"].shape[1]
    Hp = _round_up(H, 128)
    Bblk = batch_block if batch_block is not None else B
    Tc = max(1, min(time_chunk, T))
    Tp = _round_up(T, Tc)

    # dropout = identity (eval mode).  Gather directly into time-major layout
    # (only the tiny int32 ids array is transposed, not the float activations).
    ids_t = ids.T.astype(jnp.int32)                         # (T, B)
    emb = jnp.take(params["emb"], ids_t, axis=0)            # (T, B, E)

    # Lane-align each gate block: pad i/f/g/o columns from H to Hp.
    w_ih_p = _pad_gate_cols(params["w_ih"].T, H, Hp)                       # (E, 4Hp)
    bias_p = _pad_gate_cols((params["b_ih"] + params["b_hh"])[None, :], H, Hp)  # (1, 4Hp)
    w_hh_p = _pad_gate_cols(params["w_hh"].T, H, Hp)                       # (H, 4Hp)
    w_hh_p = jnp.pad(w_hh_p, ((0, Hp - H), (0, 0))).astype(mxu_dtype)      # (Hp, 4Hp)

    # Hoisted input projection: one big (T*B, E) x (E, 4Hp) matmul outside the
    # recurrence; f32 accumulation, stored in mxu_dtype to halve DMA when bf16.
    gates_x = jnp.einsum("tbe,eg->tbg",
                         emb.astype(mxu_dtype), w_ih_p.astype(mxu_dtype),
                         preferred_element_type=jnp.float32) + bias_p
    gates_x = gates_x.astype(mxu_dtype)
    if Tp != T:   # pad time to a multiple of Tc (masked / pl.when-skipped anyway)
        gates_x = jnp.pad(gates_x, ((0, Tp - T), (0, 0), (0, 0)))

    lengths_i32 = lengths.astype(jnp.int32)
    lengths_2d = lengths_i32.reshape(B, 1)
    max_len = jnp.reshape(jnp.max(lengths_i32), (1,))       # SMEM prefetch scalar

    h_final = lstm_pallas(gates_x, lengths_2d, max_len, w_hh_p,
                          Tc=Tc, Bblk=Bblk, Hp=Hp)           # (B, Hp) f32

    # FC head in XLA (O is far below a lane width; keeping it in-kernel would
    # pin W_fc in VMEM and emit a 2-lane masked store).  Dropout = identity.
    return h_final[:, :H] @ params["w_fc"].T + params["b_fc"]


def forward_ref(params, ids, lengths):
    """Pure-JAX reference (same packed-sequence semantics)."""
    B, T = ids.shape
    H = params["w_hh"].shape[1]
    emb = jnp.take(params["emb"], ids, axis=0)
    h = jnp.zeros((B, H), jnp.float32)
    c = jnp.zeros((B, H), jnp.float32)
    for t in range(T):
        x_t = emb[:, t]
        gates = (x_t @ params["w_ih"].T + h @ params["w_hh"].T
                 + params["b_ih"] + params["b_hh"])
        i_g = jax.nn.sigmoid(gates[:, 0 * H:1 * H])
        f_g = jax.nn.sigmoid(gates[:, 1 * H:2 * H])
        g_g = jnp.tanh(gates[:, 2 * H:3 * H])
        o_g = jax.nn.sigmoid(gates[:, 3 * H:4 * H])
        c_new = f_g * c + i_g * g_g
        h_new = o_g * jnp.tanh(c_new)
        mask = (t < lengths)[:, None]
        h = jnp.where(mask, h_new, h)
        c = jnp.where(mask, c_new, c)
    return h @ params["w_fc"].T + params["b_fc"]


if __name__ == "__main__":
    VOCAB, EMB, HID, OUT = 50, 16, 32, 2
    PAD_INDEX = 1
    B, T = 8, 16

    key = jax.random.PRNGKey(0)
    k_param, k_ids = jax.random.split(key)
    params = init_params(k_param, VOCAB, EMB, HID, OUT, PAD_INDEX)

    ids = jax.random.randint(k_ids, (B, T), 2, VOCAB, dtype=jnp.int32)
    lengths = jnp.array([16, 11, 7, 13, 4, 16, 9, 2], dtype=jnp.int32)
    # pad positions beyond each sequence's length with pad_index
    pos = jnp.arange(T)[None, :]
    ids = jnp.where(pos < lengths[:, None], ids, PAD_INDEX)

    ref = forward_ref(params, ids, lengths)

    # f32 path (exact-ish): default MXU dtype.
    pred = forward(params, ids, lengths)
    pred = jax.block_until_ready(pred)
    np.testing.assert_allclose(np.asarray(pred), np.asarray(ref),
                               rtol=1e-4, atol=1e-4)

    # bf16 matmul-operand path (recommended on v6e/v7x); elementwise/state stay f32.
    pred_bf16 = forward(params, ids, lengths, mxu_dtype=jnp.bfloat16)
    pred_bf16 = jax.block_until_ready(pred_bf16)
    np.testing.assert_allclose(np.asarray(pred_bf16), np.asarray(ref),
                               rtol=5e-2, atol=5e-2)

    print("KERNEL_OK")
</pallas_src>

<mosaic_0001>
module attributes {stable_mosaic.version = 11 : i64} {
  func.func @_lstm_kernel(%arg0: i32, %arg1: i32, %arg2: memref<1xi32, #tpu.memory_space<smem>>, %arg3: memref<8x8x512xf32, #tpu.memory_space<vmem>>, %arg4: memref<8x1xi32, #tpu.memory_space<vmem>>, %arg5: memref<128x512xf32, #tpu.memory_space<vmem>>, %arg6: memref<8x128xf32, #tpu.memory_space<vmem>>, %arg7: memref<8x128xf32, #tpu.memory_space<vmem>>) attributes {dimension_semantics = [#tpu.dimension_semantics<parallel>, #tpu.dimension_semantics<arbitrary>], iteration_bounds = array<i64: 1, 2>, scalar_prefetch = 1 : i64, scratch_operands = 1 : i64, tpu.core_type = #tpu.core_type<tc>, window_params = [{transform_indices = @transform_0, window_bounds = array<i64: 8, 8, 512>}, {transform_indices = @transform_1, window_bounds = array<i64: 8, 1>}, {pipeline_mode = #tpu.pipeline_mode<synchronous>, transform_indices = @transform_2, window_bounds = array<i64: 128, 512>}, {transform_indices = @transform_3, window_bounds = array<i64: 8, 128>}]} {
    %c0_i32 = arith.constant 0 : i32
    %0 = arith.cmpi eq, %arg1, %c0_i32 : i32
    %1 = arith.extui %0 : i1 to i32
    %c0_i32_0 = arith.constant 0 : i32
    %2 = arith.cmpi ne, %1, %c0_i32_0 : i32
    scf.if %2 {
      %cst = arith.constant 0.000000e+00 : f32
      %8 = vector.broadcast %cst : f32 to vector<8x128xf32>
      %c0_2 = arith.constant 0 : index
      %c0_3 = arith.constant 0 : index
      %9 = vector.load %arg6[%c0_2, %c0_3] : memref<8x128xf32, #tpu.memory_space<vmem>>, vector<8x128xf32>
      tpu.vector_store %arg6[%c0_2, %c0_3], %8 {strides = array<i32>} : memref<8x128xf32, #tpu.memory_space<vmem>>, vector<8x128xf32>,
      %cst_4 = arith.constant 0.000000e+00 : f32
      %10 = vector.broadcast %cst_4 : f32 to vector<8x128xf32>
      %c0_5 = arith.constant 0 : index
      %c0_6 = arith.constant 0 : index
      %11 = vector.load %arg7[%c0_5, %c0_6] : memref<8x128xf32, #tpu.memory_space<vmem>>, vector<8x128xf32>
      tpu.vector_store %arg7[%c0_5, %c0_6], %10 {strides = array<i32>} : memref<8x128xf32, #tpu.memory_space<vmem>>, vector<8x128xf32>,
    } else {
    }
    %c8_i32 = arith.constant 8 : i32
    %3 = arith.muli %arg1, %c8_i32 : i32
    %c0 = arith.constant 0 : index
    %4 = memref.load %arg2[%c0] : memref<1xi32, #tpu.memory_space<smem>>
    %5 = arith.cmpi slt, %3, %4 : i32
    %6 = arith.extui %5 : i1 to i32
    %c0_i32_1 = arith.constant 0 : i32
    %7 = arith.cmpi ne, %6, %c0_i32_1 : i32
    scf.if %7 {
      %c0_2 = arith.constant 0 : index
      %c0_3 = arith.constant 0 : index
      %8 = vector.load %arg4[%c0_2, %c0_3] : memref<8x1xi32, #tpu.memory_space<vmem>>, vector<8x1xi32>
      %c0_4 = arith.constant 0 : index
      %c0_5 = arith.constant 0 : index
      %9 = vector.load %arg5[%c0_4, %c0_5] : memref<128x512xf32, #tpu.memory_space<vmem>>, vector<128x512xf32>
      %c8_i32_6 = arith.constant 8 : i32
      %10 = arith.muli %arg1, %c8_i32_6 : i32
      %c0_7 = arith.constant 0 : index
      %c0_8 = arith.constant 0 : index
      %11 = vector.load %arg6[%c0_7, %c0_8] : memref<8x128xf32, #tpu.memory_space<vmem>>, vector<8x128xf32>
      %c0_9 = arith.constant 0 : index
      %c0_10 = arith.constant 0 : index
      %12 = vector.load %arg7[%c0_9, %c0_10] : memref<8x128xf32, #tpu.memory_space<vmem>>, vector<8x128xf32>
      %c0_i32_11 = arith.constant 0 : i32
      %13 = arith.index_cast %c0_i32_11 : i32 to index
      %c0_12 = arith.constant 0 : index
      %c0_13 = arith.constant 0 : index
      %14 = vector.load %arg3[%13, %c0_12, %c0_13] : memref<8x8x512xf32, #tpu.memory_space<vmem>>, vector<1x8x512xf32>
      %15 = vector.shape_cast %14 : vector<1x8x512xf32> to vector<8x512xf32>
      %cst = arith.constant dense<0.000000e+00> : vector<8x512xf32>
      %16 = tpu.matmul %11, %9, %cst {dimension_numbers = #tpu.dot_dimension_numbers<[1], [0], [0], [1], [0, 0, 1, 1], [], []>} : vector<8x128xf32>, vector<128x512xf32>, vector<8x512xf32> -> vector<8x512xf32>
      %17 = arith.addf %15, %16 : vector<8x512xf32>
      %18 = vector.extract_strided_slice %17 {offsets = [0, 0], sizes = [8, 128], strides = [1, 1]} : vector<8x512xf32> to vector<8x128xf32>
      %19 = arith.negf %18 : vector<8x128xf32>
      %20 = math.exp %19 : vector<8x128xf32>
      %cst_14 = arith.constant 1.000000e+00 : f32
      %21 = vector.broadcast %cst_14 : f32 to vector<8x128xf32>
      %22 = arith.addf %21, %20 : vector<8x128xf32>
      %23 = arith.divf %21, %22 : vector<8x128xf32>
      %24 = vector.extract_strided_slice %17 {offsets = [0, 128], sizes = [8, 128], strides = [1, 1]} : vector<8x512xf32> to vector<8x128xf32>
      %25 = arith.negf %24 : vector<8x128xf32>
      %26 = math.exp %25 : vector<8x128xf32>
      %cst_15 = arith.constant 1.000000e+00 : f32
      %27 = vector.broadcast %cst_15 : f32 to vector<8x128xf32>
      %28 = arith.addf %27, %26 : vector<8x128xf32>
      %29 = arith.divf %27, %28 : vector<8x128xf32>
      %30 = vector.extract_strided_slice %17 {offsets = [0, 256], sizes = [8, 128], strides = [1, 1]} : vector<8x512xf32> to vector<8x128xf32>
      %31 = math.tanh %30 : vector<8x128xf32>
      %32 = vector.extract_strided_slice %17 {offsets = [0, 384], sizes = [8, 128], strides = [1, 1]} : vector<8x512xf32> to vector<8x128xf32>
      %33 = arith.negf %32 : vector<8x128xf32>
      %34 = math.exp %33 : vector<8x128xf32>
      %cst_16 = arith.constant 1.000000e+00 : f32
      %35 = vector.broadcast %cst_16 : f32 to vector<8x128xf32>
      %36 = arith.addf %35, %34 : vector<8x128xf32>
      %37 = arith.divf %35, %36 : vector<8x128xf32>
      %38 = arith.mulf %29, %12 : vector<8x128xf32>
      %39 = arith.mulf %23, %31 : vector<8x128xf32>
      %40 = arith.addf %38, %39 : vector<8x128xf32>
      %41 = math.tanh %40 : vector<8x128xf32>
      %42 = arith.mulf %37, %41 : vector<8x128xf32>
      %43 = arith.addi %10, %c0_i32_11 : i32
      %44 = vector.broadcast %43 : i32 to vector<8x1xi32>
      %45 = arith.cmpi slt, %44, %8 : vector<8x1xi32>
      %46 = vector.shape_cast %45 : vector<8x1xi1> to vector<8x1xi1>
      %47 = vector.broadcast %46 : vector<8x1xi1> to vector<8x128xi1>
      %48 = arith.select %47, %42, %11 : vector<8x128xi1>, vector<8x128xf32>
      %49 = vector.shape_cast %45 : vector<8x1xi1> to vector<8x1xi1>
      %50 = vector.broadcast %49 : vector<8x1xi1> to vector<8x128xi1>
      %51 = arith.select %50, %40, %12 : vector<8x128xi1>, vector<8x128xf32>
      %c1_i32 = arith.constant 1 : i32
      %52 = arith.index_cast %c1_i32 : i32 to index
      %c0_17 = arith.constant 0 : index
      %c0_18 = arith.constant 0 : index
      %53 = vector.load %arg3[%52, %c0_17, %c0_18] : memref<8x8x512xf32, #tpu.memory_space<vmem>>, vector<1x8x512xf32>
      %54 = vector.shape_cast %53 : vector<1x8x512xf32> to vector<8x512xf32>
      %cst_19 = arith.constant dense<0.000000e+00> : vector<8x512xf32>
      %55 = tpu.matmul %48, %9, %cst_19 {dimension_numbers = #tpu.dot_dimension_numbers<[1], [0], [0], [1], [0, 0, 1, 1], [], []>} : vector<8x128xf32>, vector<128x512xf32>, vector<8x512xf32> -> vector<8x512xf32>
      %56 = arith.addf %54, %55 : vector<8x512xf32>
      %57 = vector.extract_strided_slice %56 {offsets = [0, 0], sizes = [8, 128], strides = [1, 1]} : vector<8x512xf32> to vector<8x128xf32>
      %58 = arith.negf %57 : vector<8x128xf32>
      %59 = math.exp %58 : vector<8x128xf32>
      %cst_20 = arith.constant 1.000000e+00 : f32
      %60 = vector.broadcast %cst_20 : f32 to vector<8x128xf32>
      %61 = arith.addf %60, %59 : vector<8x128xf32>
      %62 = arith.divf %60, %61 : vector<8x128xf32>
      %63 = vector.extract_strided_slice %56 {offsets = [0, 128], sizes = [8, 128], strides = [1, 1]} : vector<8x512xf32> to vector<8x128xf32>
      %64 = arith.negf %63 : vector<8x128xf32>
      %65 = math.exp %64 : vector<8x128xf32>
      %cst_21 = arith.constant 1.000000e+00 : f32
      %66 = vector.broadcast %cst_21 : f32 to vector<8x128xf32>
      %67 = arith.addf %66, %65 : vector<8x128xf32>
      %68 = arith.divf %66, %67 : vector<8x128xf32>
      %69 = vector.extract_strided_slice %56 {offsets = [0, 256], sizes = [8, 128], strides = [1, 1]} : vector<8x512xf32> to vector<8x128xf32>
      %70 = math.tanh %69 : vector<8x128xf32>
      %71 = vector.extract_strided_slice %56 {offsets = [0, 384], sizes = [8, 128], strides = [1, 1]} : vector<8x512xf32> to vector<8x128xf32>
      %72 = arith.negf %71 : vector<8x128xf32>
      %73 = math.exp %72 : vector<8x128xf32>
      %cst_22 = arith.constant 1.000000e+00 : f32
      %74 = vector.broadcast %cst_22 : f32 to vector<8x128xf32>
      %75 = arith.addf %74, %73 : vector<8x128xf32>
      %76 = arith.divf %74, %75 : vector<8x128xf32>
      %77 = arith.mulf %68, %51 : vector<8x128xf32>
      %78 = arith.mulf %62, %70 : vector<8x128xf32>
      %79 = arith.addf %77, %78 : vector<8x128xf32>
      %80 = math.tanh %79 : vector<8x128xf32>
      %81 = arith.mulf %76, %80 : vector<8x128xf32>
      %82 = arith.addi %10, %c1_i32 : i32
      %83 = vector.broadcast %82 : i32 to vector<8x1xi32>
      %84 = arith.cmpi slt, %83, %8 : vector<8x1xi32>
      %85 = vector.shape_cast %84 : vector<8x1xi1> to vector<8x1xi1>
      %86 = vector.broadcast %85 : vector<8x1xi1> to vector<8x128xi1>
      %87 = arith.select %86, %81, %48 : vector<8x128xi1>, vector<8x128xf32>
      %88 = vector.shape_cast %84 : vector<8x1xi1> to vector<8x1xi1>
      %89 = vector.broadcast %88 : vector<8x1xi1> to vector<8x128xi1>
      %90 = arith.select %89, %79, %51 : vector<8x128xi1>, vector<8x128xf32>
      %c2_i32 = arith.constant 2 : i32
      %91 = arith.index_cast %c2_i32 : i32 to index
      %c0_23 = arith.constant 0 : index
      %c0_24 = arith.constant 0 : index
      %92 = vector.load %arg3[%91, %c0_23, %c0_24] : memref<8x8x512xf32, #tpu.memory_space<vmem>>, vector<1x8x512xf32>
      %93 = vector.shape_cast %92 : vector<1x8x512xf32> to vector<8x512xf32>
      %cst_25 = arith.constant dense<0.000000e+00> : vector<8x512xf32>
      %94 = tpu.matmul %87, %9, %cst_25 {dimension_numbers = #tpu.dot_dimension_numbers<[1], [0], [0], [1], [0, 0, 1, 1], [], []>} : vector<8x128xf32>, vector<128x512xf32>, vector<8x512xf32> -> vector<8x512xf32>
      %95 = arith.addf %93, %94 : vector<8x512xf32>
      %96 = vector.extract_strided_slice %95 {offsets = [0, 0], sizes = [8, 128], strides = [1, 1]} : vector<8x512xf32> to vector<8x128xf32>
      %97 = arith.negf %96 : vector<8x128xf32>
      %98 = math.exp %97 : vector<8x128xf32>
      %cst_26 = arith.constant 1.000000e+00 : f32
      %99 = vector.broadcast %cst_26 : f32 to vector<8x128xf32>
      %100 = arith.addf %99, %98 : vector<8x128xf32>
      %101 = arith.divf %99, %100 : vector<8x128xf32>
      %102 = vector.extract_strided_slice %95 {offsets = [0, 128], sizes = [8, 128], strides = [1, 1]} : vector<8x512xf32> to vector<8x128xf32>
      %103 = arith.negf %102 : vector<8x128xf32>
      %104 = math.exp %103 : vector<8x128xf32>
      %cst_27 = arith.constant 1.000000e+00 : f32
      %105 = vector.broadcast %cst_27 : f32 to vector<8x128xf32>
      %106 = arith.addf %105, %104 : vector<8x128xf32>
      %107 = arith.divf %105, %106 : vector<8x128xf32>
      %108 = vector.extract_strided_slice %95 {offsets = [0, 256], sizes = [8, 128], strides = [1, 1]} : vector<8x512xf32> to vector<8x128xf32>
      %109 = math.tanh %108 : vector<8x128xf32>
      %110 = vector.extract_strided_slice %95 {offsets = [0, 384], sizes = [8, 128], strides = [1, 1]} : vector<8x512xf32> to vector<8x128xf32>
      %111 = arith.negf %110 : vector<8x128xf32>
      %112 = math.exp %111 : vector<8x128xf32>
      %cst_28 = arith.constant 1.000000e+00 : f32
      %113 = vector.broadcast %cst_28 : f32 to vector<8x128xf32>
      %114 = arith.addf %113, %112 : vector<8x128xf32>
      %115 = arith.divf %113, %114 : vector<8x128xf32>
      %116 = arith.mulf %107, %90 : vector<8x128xf32>
      %117 = arith.mulf %101, %109 : vector<8x128xf32>
      %118 = arith.addf %116, %117 : vector<8x128xf32>
      %119 = math.tanh %118 : vector<8x128xf32>
      %120 = arith.mulf %115, %119 : vector<8x128xf32>
      %121 = arith.addi %10, %c2_i32 : i32
      %122 = vector.broadcast %121 : i32 to vector<8x1xi32>
      %123 = arith.cmpi slt, %122, %8 : vector<8x1xi32>
      %124 = vector.shape_cast %123 : vector<8x1xi1> to vector<8x1xi1>
      %125 = vector.broadcast %124 : vector<8x1xi1> to vector<8x128xi1>
      %126 = arith.select %125, %120, %87 : vector<8x128xi1>, vector<8x128xf32>
      %127 = vector.shape_cast %123 : vector<8x1xi1> to vector<8x1xi1>
      %128 = vector.broadcast %127 : vector<8x1xi1> to vector<8x128xi1>
      %129 = arith.select %128, %118, %90 : vector<8x128xi1>, vector<8x128xf32>
      %c3_i32 = arith.constant 3 : i32
      %130 = arith.index_cast %c3_i32 : i32 to index
      %c0_29 = arith.constant 0 : index
      %c0_30 = arith.constant 0 : index
      %131 = vector.load %arg3[%130, %c0_29, %c0_30] : memref<8x8x512xf32, #tpu.memory_space<vmem>>, vector<1x8x512xf32>
      %132 = vector.shape_cast %131 : vector<1x8x512xf32> to vector<8x512xf32>
      %cst_31 = arith.constant dense<0.000000e+00> : vector<8x512xf32>
      %133 = tpu.matmul %126, %9, %cst_31 {dimension_numbers = #tpu.dot_dimension_numbers<[1], [0], [0], [1], [0, 0, 1, 1], [], []>} : vector<8x128xf32>, vector<128x512xf32>, vector<8x512xf32> -> vector<8x512xf32>
      %134 = arith.addf %132, %133 : vector<8x512xf32>
      %135 = vector.extract_strided_slice %134 {offsets = [0, 0], sizes = [8, 128], strides = [1, 1]} : vector<8x512xf32> to vector<8x128xf32>
      %136 = arith.negf %135 : vector<8x128xf32>
      %137 = math.exp %136 : vector<8x128xf32>
      %cst_32 = arith.constant 1.000000e+00 : f32
      %138 = vector.broadcast %cst_32 : f32 to vector<8x128xf32>
      %139 = arith.addf %138, %137 : vector<8x128xf32>
      %140 = arith.divf %138, %139 : vector<8x128xf32>
      %141 = vector.extract_strided_slice %134 {offsets = [0, 128], sizes = [8, 128], strides = [1, 1]} : vector<8x512xf32> to vector<8x128xf32>
      %142 = arith.negf %141 : vector<8x128xf32>
      %143 = math.exp %142 : vector<8x128xf32>
      %cst_33 = arith.constant 1.000000e+00 : f32
      %144 = vector.broadcast %cst_33 : f32 to vector<8x128xf32>
      %145 = arith.addf %144, %143 : vector<8x128xf32>
      %146 = arith.divf %144, %145 : vector<8x128xf32>
      %147 = vector.extract_strided_slice %134 {offsets = [0, 256], sizes = [8, 128], strides = [1, 1]} : vector<8x512xf32> to vector<8x128xf32>
      %148 = math.tanh %147 : vector<8x128xf32>
      %149 = vector.extract_strided_slice %134 {offsets = [0, 384], sizes = [8, 128], strides = [1, 1]} : vector<8x512xf32> to vector<8x128xf32>
      %150 = arith.negf %149 : vector<8x128xf32>
      %151 = math.exp %150 : vector<8x128xf32>
      %cst_34 = arith.constant 1.000000e+00 : f32
      %152 = vector.broadcast %cst_34 : f32 to vector<8x128xf32>
      %153 = arith.addf %152, %151 : vector<8x128xf32>
      %154 = arith.divf %152, %153 : vector<8x128xf32>
      %155 = arith.mulf %146, %129 : vector<8x128xf32>
      %156 = arith.mulf %140, %148 : vector<8x128xf32>
      %157 = arith.addf %155, %156 : vector<8x128xf32>
      %158 = math.tanh %157 : vector<8x128xf32>
      %159 = arith.mulf %154, %158 : vector<8x128xf32>
      %160 = arith.addi %10, %c3_i32 : i32
      %161 = vector.broadcast %160 : i32 to vector<8x1xi32>
      %162 = arith.cmpi slt, %161, %8 : vector<8x1xi32>
      %163 = vector.shape_cast %162 : vector<8x1xi1> to vector<8x1xi1>
      %164 = vector.broadcast %163 : vector<8x1xi1> to vector<8x128xi1>
      %165 = arith.select %164, %159, %126 : vector<8x128xi1>, vector<8x128xf32>
      %166 = vector.shape_cast %162 : vector<8x1xi1> to vector<8x1xi1>
      %167 = vector.broadcast %166 : vector<8x1xi1> to vector<8x128xi1>
      %168 = arith.select %167, %157, %129 : vector<8x128xi1>, vector<8x128xf32>
      %c4_i32 = arith.constant 4 : i32
      %169 = arith.index_cast %c4_i32 : i32 to index
      %c0_35 = arith.constant 0 : index
      %c0_36 = arith.constant 0 : index
      %170 = vector.load %arg3[%169, %c0_35, %c0_36] : memref<8x8x512xf32, #tpu.memory_space<vmem>>, vector<1x8x512xf32>
      %171 = vector.shape_cast %170 : vector<1x8x512xf32> to vector<8x512xf32>
      %cst_37 = arith.constant dense<0.000000e+00> : vector<8x512xf32>
      %172 = tpu.matmul %165, %9, %cst_37 {dimension_numbers = #tpu.dot_dimension_numbers<[1], [0], [0], [1], [0, 0, 1, 1], [], []>} : vector<8x128xf32>, vector<128x512xf32>, vector<8x512xf32> -> vector<8x512xf32>
      %173 = arith.addf %171, %172 : vector<8x512xf32>
      %174 = vector.extract_strided_slice %173 {offsets = [0, 0], sizes = [8, 128], strides = [1, 1]} : vector<8x512xf32> to vector<8x128xf32>
      %175 = arith.negf %174 : vector<8x128xf32>
      %176 = math.exp %175 : vector<8x128xf32>
      %cst_38 = arith.constant 1.000000e+00 : f32
      %177 = vector.broadcast %cst_38 : f32 to vector<8x128xf32>
      %178 = arith.addf %177, %176 : vector<8x128xf32>
      %179 = arith.divf %177, %178 : vector<8x128xf32>
      %180 = vector.extract_strided_slice %173 {offsets = [0, 128], sizes = [8, 128], strides = [1, 1]} : vector<8x512xf32> to vector<8x128xf32>
      %181 = arith.negf %180 : vector<8x128xf32>
      %182 = math.exp %181 : vector<8x128xf32>
      %cst_39 = arith.constant 1.000000e+00 : f32
      %183 = vector.broadcast %cst_39 : f32 to vector<8x128xf32>
      %184 = arith.addf %183, %182 : vector<8x128xf32>
      %185 = arith.divf %183, %184 : vector<8x128xf32>
      %186 = vector.extract_strided_slice %173 {offsets = [0, 256], sizes = [8, 128], strides = [1, 1]} : vector<8x512xf32> to vector<8x128xf32>
      %187 = math.tanh %186 : vector<8x128xf32>
      %188 = vector.extract_strided_slice %173 {offsets = [0, 384], sizes = [8, 128], strides = [1, 1]} : vector<8x512xf32> to vector<8x128xf32>
      %189 = arith.negf %188 : vector<8x128xf32>
      %190 = math.exp %189 : vector<8x128xf32>
      %cst_40 = arith.constant 1.000000e+00 : f32
      %191 = vector.broadcast %cst_40 : f32 to vector<8x128xf32>
      %192 = arith.addf %191, %190 : vector<8x128xf32>
      %193 = arith.divf %191, %192 : vector<8x128xf32>
      %194 = arith.mulf %185, %168 : vector<8x128xf32>
      %195 = arith.mulf %179, %187 : vector<8x128xf32>
      %196 = arith.addf %194, %195 : vector<8x128xf32>
      %197 = math.tanh %196 : vector<8x128xf32>
      %198 = arith.mulf %193, %197 : vector<8x128xf32>
      %199 = arith.addi %10, %c4_i32 : i32
      %200 = vector.broadcast %199 : i32 to vector<8x1xi32>
      %201 = arith.cmpi slt, %200, %8 : vector<8x1xi32>
      %202 = vector.shape_cast %201 : vector<8x1xi1> to vector<8x1xi1>
      %203 = vector.broadcast %202 : vector<8x1xi1> to vector<8x128xi1>
      %204 = arith.select %203, %198, %165 : vector<8x128xi1>, vector<8x128xf32>
      %205 = vector.shape_cast %201 : vector<8x1xi1> to vector<8x1xi1>
      %206 = vector.broadcast %205 : vector<8x1xi1> to vector<8x128xi1>
      %207 = arith.select %206, %196, %168 : vector<8x128xi1>, vector<8x128xf32>
      %c5_i32 = arith.constant 5 : i32
      %208 = arith.index_cast %c5_i32 : i32 to index
      %c0_41 = arith.constant 0 : index
      %c0_42 = arith.constant 0 : index
      %209 = vector.load %arg3[%208, %c0_41, %c0_42] : memref<8x8x512xf32, #tpu.memory_space<vmem>>, vector<1x8x512xf32>
      %210 = vector.shape_cast %209 : vector<1x8x512xf32> to vector<8x512xf32>
      %cst_43 = arith.constant dense<0.000000e+00> : vector<8x512xf32>
      %211 = tpu.matmul %204, %9, %cst_43 {dimension_numbers = #tpu.dot_dimension_numbers<[1], [0], [0], [1], [0, 0, 1, 1], [], []>} : vector<8x128xf32>, vector<128x512xf32>, vector<8x512xf32> -> vector<8x512xf32>
      %212 = arith.addf %210, %211 : vector<8x512xf32>
      %213 = vector.extract_strided_slice %212 {offsets = [0, 0], sizes = [8, 128], strides = [1, 1]} : vector<8x512xf32> to vector<8x128xf32>
      %214 = arith.negf %213 : vector<8x128xf32>
      %215 = math.exp %214 : vector<8x128xf32>
      %cst_44 = arith.constant 1.000000e+00 : f32
      %216 = vector.broadcast %cst_44 : f32 to vector<8x128xf32>
      %217 = arith.addf %216, %215 : vector<8x128xf32>
      %218 = arith.divf %216, %217 : vector<8x128xf32>
      %219 = vector.extract_strided_slice %212 {offsets = [0, 128], sizes = [8, 128], strides = [1, 1]} : vector<8x512xf32> to vector<8x128xf32>
      %220 = arith.negf %219 : vector<8x128xf32>
      %221 = math.exp %220 : vector<8x128xf32>
      %cst_45 = arith.constant 1.000000e+00 : f32
      %222 = vector.broadcast %cst_45 : f32 to vector<8x128xf32>
      %223 = arith.addf %222, %221 : vector<8x128xf32>
      %224 = arith.divf %222, %223 : vector<8x128xf32>
      %225 = vector.extract_strided_slice %212 {offsets = [0, 256], sizes = [8, 128], strides = [1, 1]} : vector<8x512xf32> to vector<8x128xf32>
      %226 = math.tanh %225 : vector<8x128xf32>
      %227 = vector.extract_strided_slice %212 {offsets = [0, 384], sizes = [8, 128], strides = [1, 1]} : vector<8x512xf32> to vector<8x128xf32>
      %228 = arith.negf %227 : vector<8x128xf32>
      %229 = math.exp %228 : vector<8x128xf32>
      %cst_46 = arith.constant 1.000000e+00 : f32
      %230 = vector.broadcast %cst_46 : f32 to vector<8x128xf32>
      %231 = arith.addf %230, %229 : vector<8x128xf32>
      %232 = arith.divf %230, %231 : vector<8x128xf32>
      %233 = arith.mulf %224, %207 : vector<8x128xf32>
      %234 = arith.mulf %218, %226 : vector<8x128xf32>
      %235 = arith.addf %233, %234 : vector<8x128xf32>
      %236 = math.tanh %235 : vector<8x128xf32>
      %237 = arith.mulf %232, %236 : vector<8x128xf32>
      %238 = arith.addi %10, %c5_i32 : i32
      %239 = vector.broadcast %238 : i32 to vector<8x1xi32>
      %240 = arith.cmpi slt, %239, %8 : vector<8x1xi32>
      %241 = vector.shape_cast %240 : vector<8x1xi1> to vector<8x1xi1>
      %242 = vector.broadcast %241 : vector<8x1xi1> to vector<8x128xi1>
      %243 = arith.select %242, %237, %204 : vector<8x128xi1>, vector<8x128xf32>
      %244 = vector.shape_cast %240 : vector<8x1xi1> to vector<8x1xi1>
      %245 = vector.broadcast %244 : vector<8x1xi1> to vector<8x128xi1>
      %246 = arith.select %245, %235, %207 : vector<8x128xi1>, vector<8x128xf32>
      %c6_i32 = arith.constant 6 : i32
      %247 = arith.index_cast %c6_i32 : i32 to index
      %c0_47 = arith.constant 0 : index
      %c0_48 = arith.constant 0 : index
      %248 = vector.load %arg3[%247, %c0_47, %c0_48] : memref<8x8x512xf32, #tpu.memory_space<vmem>>, vector<1x8x512xf32>
      %249 = vector.shape_cast %248 : vector<1x8x512xf32> to vector<8x512xf32>
      %cst_49 = arith.constant dense<0.000000e+00> : vector<8x512xf32>
      %250 = tpu.matmul %243, %9, %cst_49 {dimension_numbers = #tpu.dot_dimension_numbers<[1], [0], [0], [1], [0, 0, 1, 1], [], []>} : vector<8x128xf32>, vector<128x512xf32>, vector<8x512xf32> -> vector<8x512xf32>
      %251 = arith.addf %249, %250 : vector<8x512xf32>
      %252 = vector.extract_strided_slice %251 {offsets = [0, 0], sizes = [8, 128], strides = [1, 1]} : vector<8x512xf32> to vector<8x128xf32>
      %253 = arith.negf %252 : vector<8x128xf32>
      %254 = math.exp %253 : vector<8x128xf32>
      %cst_50 = arith.constant 1.000000e+00 : f32
      %255 = vector.broadcast %cst_50 : f32 to vector<8x128xf32>
      %256 = arith.addf %255, %254 : vector<8x128xf32>
      %257 = arith.divf %255, %256 : vector<8x128xf32>
      %258 = vector.extract_strided_slice %251 {offsets = [0, 128], sizes = [8, 128], strides = [1, 1]} : vector<8x512xf32> to vector<8x128xf32>
      %259 = arith.negf %258 : vector<8x128xf32>
      %260 = math.exp %259 : vector<8x128xf32>
      %cst_51 = arith.constant 1.000000e+00 : f32
      %261 = vector.broadcast %cst_51 : f32 to vector<8x128xf32>
      %262 = arith.addf %261, %260 : vector<8x128xf32>
      %263 = arith.divf %261, %262 : vector<8x128xf32>
      %264 = vector.extract_strided_slice %251 {offsets = [0, 256], sizes = [8, 128], strides = [1, 1]} : vector<8x512xf32> to vector<8x128xf32>
      %265 = math.tanh %264 : vector<8x128xf32>
      %266 = vector.extract_strided_slice %251 {offsets = [0, 384], sizes = [8, 128], strides = [1, 1]} : vector<8x512xf32> to vector<8x128xf32>
      %267 = arith.negf %266 : vector<8x128xf32>
      %268 = math.exp %267 : vector<8x128xf32>
      %cst_52 = arith.constant 1.000000e+00 : f32
      %269 = vector.broadcast %cst_52 : f32 to vector<8x128xf32>
      %270 = arith.addf %269, %268 : vector<8x128xf32>
      %271 = arith.divf %269, %270 : vector<8x128xf32>
      %272 = arith.mulf %263, %246 : vector<8x128xf32>
      %273 = arith.mulf %257, %265 : vector<8x128xf32>
      %274 = arith.addf %272, %273 : vector<8x128xf32>
      %275 = math.tanh %274 : vector<8x128xf32>
      %276 = arith.mulf %271, %275 : vector<8x128xf32>
      %277 = arith.addi %10, %c6_i32 : i32
      %278 = vector.broadcast %277 : i32 to vector<8x1xi32>
      %279 = arith.cmpi slt, %278, %8 : vector<8x1xi32>
      %280 = vector.shape_cast %279 : vector<8x1xi1> to vector<8x1xi1>
      %281 = vector.broadcast %280 : vector<8x1xi1> to vector<8x128xi1>
      %282 = arith.select %281, %276, %243 : vector<8x128xi1>, vector<8x128xf32>
      %283 = vector.shape_cast %279 : vector<8x1xi1> to vector<8x1xi1>
      %284 = vector.broadcast %283 : vector<8x1xi1> to vector<8x128xi1>
      %285 = arith.select %284, %274, %246 : vector<8x128xi1>, vector<8x128xf32>
      %c7_i32 = arith.constant 7 : i32
      %286 = arith.index_cast %c7_i32 : i32 to index
      %c0_53 = arith.constant 0 : index
      %c0_54 = arith.constant 0 : index
      %287 = vector.load %arg3[%286, %c0_53, %c0_54] : memref<8x8x512xf32, #tpu.memory_space<vmem>>, vector<1x8x512xf32>
      %288 = vector.shape_cast %287 : vector<1x8x512xf32> to vector<8x512xf32>
      %cst_55 = arith.constant dense<0.000000e+00> : vector<8x512xf32>
      %289 = tpu.matmul %282, %9, %cst_55 {dimension_numbers = #tpu.dot_dimension_numbers<[1], [0], [0], [1], [0, 0, 1, 1], [], []>} : vector<8x128xf32>, vector<128x512xf32>, vector<8x512xf32> -> vector<8x512xf32>
      %290 = arith.addf %288, %289 : vector<8x512xf32>
      %291 = vector.extract_strided_slice %290 {offsets = [0, 0], sizes = [8, 128], strides = [1, 1]} : vector<8x512xf32> to vector<8x128xf32>
      %292 = arith.negf %291 : vector<8x128xf32>
      %293 = math.exp %292 : vector<8x128xf32>
      %cst_56 = arith.constant 1.000000e+00 : f32
      %294 = vector.broadcast %cst_56 : f32 to vector<8x128xf32>
      %295 = arith.addf %294, %293 : vector<8x128xf32>
      %296 = arith.divf %294, %295 : vector<8x128xf32>
      %297 = vector.extract_strided_slice %290 {offsets = [0, 128], sizes = [8, 128], strides = [1, 1]} : vector<8x512xf32> to vector<8x128xf32>
      %298 = arith.negf %297 : vector<8x128xf32>
      %299 = math.exp %298 : vector<8x128xf32>
      %cst_57 = arith.constant 1.000000e+00 : f32
      %300 = vector.broadcast %cst_57 : f32 to vector<8x128xf32>
      %301 = arith.addf %300, %299 : vector<8x128xf32>
      %302 = arith.divf %300, %301 : vector<8x128xf32>
      %303 = vector.extract_strided_slice %290 {offsets = [0, 256], sizes = [8, 128], strides = [1, 1]} : vector<8x512xf32> to vector<8x128xf32>
      %304 = math.tanh %303 : vector<8x128xf32>
      %305 = vector.extract_strided_slice %290 {offsets = [0, 384], sizes = [8, 128], strides = [1, 1]} : vector<8x512xf32> to vector<8x128xf32>
      %306 = arith.negf %305 : vector<8x128xf32>
      %307 = math.exp %306 : vector<8x128xf32>
      %cst_58 = arith.constant 1.000000e+00 : f32
      %308 = vector.broadcast %cst_58 : f32 to vector<8x128xf32>
      %309 = arith.addf %308, %307 : vector<8x128xf32>
      %310 = arith.divf %308, %309 : vector<8x128xf32>
      %311 = arith.mulf %302, %285 : vector<8x128xf32>
      %312 = arith.mulf %296, %304 : vector<8x128xf32>
      %313 = arith.addf %311, %312 : vector<8x128xf32>
      %314 = math.tanh %313 : vector<8x128xf32>
      %315 = arith.mulf %310, %314 : vector<8x128xf32>
      %316 = arith.addi %10, %c7_i32 : i32
      %317 = vector.broadcast %316 : i32 to vector<8x1xi32>
      %318 = arith.cmpi slt, %317, %8 : vector<8x1xi32>
      %319 = vector.shape_cast %318 : vector<8x1xi1> to vector<8x1xi1>
      %320 = vector.broadcast %319 : vector<8x1xi1> to vector<8x128xi1>
      %321 = arith.select %320, %315, %282 : vector<8x128xi1>, vector<8x128xf32>
      %322 = vector.shape_cast %318 : vector<8x1xi1> to vector<8x1xi1>
      %323 = vector.broadcast %322 : vector<8x1xi1> to vector<8x128xi1>
      %324 = arith.select %323, %313, %285 : vector<8x128xi1>, vector<8x128xf32>
      %c8_i32_59 = arith.constant 8 : i32
      %c0_60 = arith.constant 0 : index
      %c0_61 = arith.constant 0 : index
      %325 = vector.load %arg6[%c0_60, %c0_61] : memref<8x128xf32, #tpu.memory_space<vmem>>, vector<8x128xf32>
      tpu.vector_store %arg6[%c0_60, %c0_61], %321 {strides = array<i32>} : memref<8x128xf32, #tpu.memory_space<vmem>>, vector<8x128xf32>,
      %c0_62 = arith.constant 0 : index
      %c0_63 = arith.constant 0 : index
      %326 = vector.load %arg7[%c0_62, %c0_63] : memref<8x128xf32, #tpu.memory_space<vmem>>, vector<8x128xf32>
      tpu.vector_store %arg7[%c0_62, %c0_63], %324 {strides = array<i32>} : memref<8x128xf32, #tpu.memory_space<vmem>>, vector<8x128xf32>,
    } else {
    }
    return
  }
  func.func @transform_0(%arg0: i32, %arg1: i32, %arg2: memref<1xi32, #tpu.memory_space<smem>>) -> (i32, i32, i32) {
    %c0_i32 = arith.constant 0 : i32
    %c0_i32_0 = arith.constant 0 : i32
    return %arg1, %arg0, %c0_i32 : i32, i32, i32
  }
  func.func @transform_1(%arg0: i32, %arg1: i32, %arg2: memref<1xi32, #tpu.memory_space<smem>>) -> (i32, i32) {
    %c0_i32 = arith.constant 0 : i32
    %c0_i32_0 = arith.constant 0 : i32
    return %arg0, %c0_i32 : i32, i32
  }
  func.func @transform_2(%arg0: i32, %arg1: i32, %arg2: memref<1xi32, #tpu.memory_space<smem>>) -> (i32, i32) {
    %c0_i32 = arith.constant 0 : i32
    %c0_i32_0 = arith.constant 0 : i32
    %c0_i32_1 = arith.constant 0 : i32
    return %c0_i32, %c0_i32_0 : i32, i32
  }
  func.func @transform_3(%arg0: i32, %arg1: i32, %arg2: memref<1xi32, #tpu.memory_space<smem>>) -> (i32, i32) {
    %c0_i32 = arith.constant 0 : i32
    %c0_i32_0 = arith.constant 0 : i32
    return %arg0, %c0_i32 : i32, i32
  }
}

</mosaic_0001>

<bundles_post_ra>
// kernel: tpu_custom_call.1
= control target key start
LH: loop header
LB: loop body
LE: loop exit
PB: predicated region body
PF: predicated region fallthrough
CT: control target
= control target key end

     0   :  { %s3464_s0 = inlined_call_operand.<no memory space> [shape: s32[1], index: 0, kind: input, shape index: {}]   ;;  %s3465_s1 = inlined_call_operand.hbm [shape: f32[16,8,512], index: 1, kind: input, shape index: {}]   ;;  %s3466_s2 = inlined_call_operand.vmem [shape: s32[8,1], index: 2, kind: input, shape index: {}]   ;;  %s3467_s3 = inlined_call_operand.hbm [shape: f32[128,512], index: 3, kind: input, shape index: {}]   ;;  %s3468_s4 = inlined_call_operand.hbm [shape: f32[8,128], index: 4, kind: output, shape index: {}]  }
   0x1   :  { %9 = sst [smem:[#allocation4]] %s3464_s0 }
   0x2   :  { %10 = vsyncpa [#allocation6], 0 }
   0x3   :  { %12 = vsyncpa [#allocation6 + $0x1], 0 }
   0x4   :  { %13 = vsyncpa [#allocation9], 0 }
   0x5   :  { %14 = vsyncpa [#allocation7], 0  ;;  %s2410_s17 = smov 0   ;;  %s2412_s18 = smov 0  }
   0x6   :  { %s2414_s19 = smov 0   ;;  %s2416_s20 = smov 0  }
   0x7   :  { %s2418_s21 = smov 0   ;;  %s2420_s22 = smov 0  }
   0x8 LB: > { %s1891_s0 = sadd.s32 4294967295, %s2372_s22   ;;  %p54_p0 = scmp.ne.s32.totalorder %s2356_s18, %s2352_s17  ;;  %s2372_s22 = sphi %s2420_s22, %s20_s22   ;;  %s2368_s21 = sphi %s2418_s21, %s3733_s21   ;;  %s2364_s20 = sphi %s2416_s20, %s3732_s20   ;;  %s2360_s19 = sphi %s2414_s19, %s3731_s19   ;;  %s2356_s18 = sphi %s2412_s18, %s3730_s18   ;;  %s2352_s17 = sphi %s2410_s17, %s3729_s17  }
   0x9   : > { %p2442_p1 = scmp.eq.s32.totalorder %s1891_s0, 0  ;;  %p1892_p2 = scmp.ge.s32.totalorder %s2372_s22, 1 }
   0xa   : > { %p138_p3 = scmp.lt.s32.totalorder %s2372_s22, 3  ;;  %s2374_s26 = smov [#allocation8]  }
   0xb   : > { %p2450_p4 = por %p2442_p1, %p54_p0  ;;  %s157_s27 = sshll.u32 %s2374_s26, 4  ;;  %s158_s27 = int_to_ptr.vmem [resolvable:$true] %s157_s27 }
   0xc   : > { %p2454_p5 = pnand %p1892_p2, %p138_p3  ;;  %s29_s29 = sadd.s32 1, %s2368_s21 }
   0xd   : > { %s2247_s30 = scalar_lea.vmem %s158_s27, 8192  ;;  %p2255_p12 = scmp.lt.s32.totalorder %s158_s27, %s158_s27 }
   0xe   : > { %p1974_p6 = pneg %p2454_p5  ;;  %p2248_p9 = scmp.ne.s32.totalorder %s158_s27, %s2247_s30 }
   0xf   : > { %p2256_p13 = scmp.lt.s32.totalorder %s2247_s30, %s2247_s30 }
  0x10   : > { %p2462_p7 = pnand %p1974_p6, %p2442_p1 }
  0x11   : > { %p2257_p0 = por %p2256_p13, %p2255_p12 }
  0x12   : > { %p2238_p8 = pneg %p2462_p7 }
  0x14   : > { %p2250_p10 = pnand %p2248_p9, %p2238_p8 }
  0x16   : > { %p2251_p11 = pneg %p2250_p10 }
  0x18   : > { %p2258_p2 = pnand %p2257_p0, %p2251_p11 }
  0x1a   : > { %2261 = shalt.err (!%p2258_p2)
}
  0x1b   : > { %s2375_s5 = smov 512   ;;  %s2376_s6 = smov 32  }
  0x1c   : > { %1977 = dma.hbm_to_vmem [thread:$0]  (!%p2462_p7), %s3467_s3, 8192, %s158_s27, [#allocation9], %s2375_s5, %s2375_s5, %s2376_s6  }
  0x1d   : > { %p30_p3 = scmp.ge.s32.totalorder %s29_s29, 2  ;;  %s41_s9 = sadd.s32 1, %s2360_s19 }
  0x1e   : > { %p48_p6 = scmp.ne.s32.totalorder %s2360_s19, %s2356_s18  ;;  %p49_p8 = scmp.eq.s32.totalorder %s2372_s22, 0 }
  0x1f   : > { %s3735_s29 = smov (%p30_p3, %s29_s29), 0  ;;  %p1983_p10 = scmp.lt.s32.totalorder %s2372_s22, 2 }
  0x20   : > { %p50_p9 = por %p49_p8, %p48_p6  ;;  %s36_s10 = ssub.s32 %s2368_s21, %s3735_s29 }
  0x21   : > { %s171_s11 = sand.u32 1, %s2360_s19   ;;  %p39_p11 = scmp.eq.s32.totalorder %s36_s10, 0 }
  0x22   : > { %s1896_s12 = sshll.u32 %s171_s11, 8  ;;  %s1963_s13 = sshll.u32 %s2368_s21, 12 }
  0x23   : > { %s2489_s14 = scalar_select %p39_p11, %s2360_s19, %s41_s9  }
  0x24   : > { %s184_s17 = scalar_lea.hbm %s3465_s1, %s1963_s13  ;;  %s175_s26 = scalar_lea.vmem [#allocation5], %s1896_s12 }
  0x25   : > { %s185_s27 = sshll.u32 %s175_s26, 4  ;;  %p2494_p7 = pnand %p1983_p10, %p50_p9  ;;  %s186_s27 = int_to_ptr.vmem [resolvable:$true] %s185_s27 }
  0x26   : > { %s172_s30 = scalar_lea.sflag [#allocation6], %s171_s11  ;;  %s2275_s7 = scalar_lea.vmem %s186_s27, 4096 }
  0x27   : > { %p2264_p12 = pneg %p2494_p7  ;;  %p2276_p13 = scmp.ne.s32.totalorder %s186_s27, %s2275_s7 }
  0x28   : > { %s2377_s8 = smov [#allocation5]  }
  0x29   : > { %p2278_p0 = pnand %p2276_p13, %p2264_p12  ;;  %s2280_s9 = sshll.u32 %s2377_s8, 4  ;;  %s2281_s9 = int_to_ptr.vmem [resolvable:$false] %s2280_s9 }
  0x2a   : > { %s2282_s10 = scalar_lea.vmem %s2281_s9, 8192  ;;  %p2283_p3 = scmp.lt.s32.totalorder %s186_s27, %s2281_s9 }
  0x2b   : > { %p2279_p2 = pneg %p2278_p0  ;;  %p2284_p6 = scmp.lt.s32.totalorder %s2282_s10, %s2275_s7 }
  0x2d   : > { %p2285_p8 = por %p2284_p6, %p2283_p3 }
  0x2f   : > { %p2286_p9 = pnand %p2285_p8, %p2279_p2 }
  0x31   : > { %2289 = shalt.err (!%p2286_p9)
}
  0x32   : > { %1981 = dma.hbm_to_vmem [thread:$0]  (!%p2494_p7), %s184_s17, 4096, %s186_s27, %s172_s30, %s2375_s5, %s2375_s5, %s2376_s6  }
  0x33   : > { %197 = sbr.rel (%p2454_p5) target bundleno = 2130 (0x852), region = 32  ;;  %s199_s11 = sand.u32 (!%p2454_p5), 1, %s2356_s18  }
  0x34   : > { %s1901_s12 = sshll.u32 (!%p2454_p5), %s199_s11, 8  ;;  %s200_s13 = scalar_lea.sflag (!%p2454_p5), [#allocation6], %s199_s11 }
  0x35   : > { %s2508_s15 = scalar_lea.vmem (!%p2454_p5), [#allocation5], %s1901_s12 }
  0x38   : > { %2339 = dma.done.wait (%p2450_p4), %s200_s13, 4096  }
  0x39   : > { %2341 = vsyncadd (%p2450_p4), %s200_s13, 4294963200 }
  0x3a   : > { %2343 = dma.done.wait (%p2442_p1), [#allocation9], 8192  }
  0x3b   : > { %2345 = vsyncadd (%p2442_p1), [#allocation9], 4294959104  ;;  %p1903_p5 = scmp.ne.s32.totalorder %s2364_s20, 0 }
  0x3d   : > { %237 = sbr.rel (%p1903_p5) target bundleno = 68 (0x44), region = 44 }
  0x42   : > { %v2378_v0 = vmov 0.0  }
  0x43   : > { %238 = vst [vmem:[#allocation10] sm:$0xff] %v2378_v0  ;;  %239 = vst [vmem:[#allocation2] sm:$0xff] %v2378_v0 }
  0x44 PF: > { %s2520_s25 = sshll.u32 %s2364_s20, 3  ;;  %s241_s5 = sld [smem:[#allocation4]] }
  0x4a   : > { %p1905_p10 = scmp.ge.s32.totalorder %s2520_s25, %s241_s5 }
  0x4c   : > { %245 = sbr.rel (%p1905_p10) target bundleno = 2115 (0x843), region = 48 }
  0x51   : > { %v2523_v1 = vld [vmem:[#allocation8 + $0x1e8] sm:$0xff]  ;;  %v2525_v2 = vld [vmem:[#allocation8 + $0x1e0] sm:$0xff]  ;;  %v3469_v5 = vmov 0.0   ;;  %v3471_v8 = vmov 0   ;;  %v2548_v11 = vld [vmem:[#allocation8 + $0x1f8] sm:$0xff]  ;;  %v487_v55 = vstv %s2520_s25  ;;  %s671_s24 = sadd.s32 1, %s2520_s25 }
  0x52   : > { %3568 = vst [vmem:[#allocation14_spill] sm:$0xff] %v2523_v1  ;;  %v2527_v3 = vld [vmem:[#allocation8 + $0x1c8] sm:$0xff]  ;;  %317 = vmatprep.subr.mxu0 %v2523_v1  ;;  %v2530_v4 = vld [vmem:[#allocation8 + $0x1c0] sm:$0xff]  ;;  %381 = vmatprep.mubr.f32.mxu0 %v3469_v5  ;;  %3569 = vst [vmem:[#allocation15_spill] sm:$0xff] %v2548_v11  ;;  %v672_v0 = vstv %s671_s24  ;;  %s1226_s6 = sadd.s32 4, %s2520_s25  ;;  %s1596_s16 = sadd.s32 6, %s2520_s25 }
  0x53   : > { %318 = vmatpush1.msra.mxu0 %v2525_v2  ;;  %v2534_v6 = vld [vmem:[#allocation8 + $0x1a8] sm:$0xff]  ;;  %452 = vmatprep.mubr.f32.mxu1 %v3469_v5  ;;  %v2538_v7 = vld [vmem:[#allocation8 + $0x1a0] sm:$0xff]  ;;  %v2554_v13 = vld [vmem:[#allocation8 + $0x1f0] sm:$0xff]  ;;  %s856_s17 = sadd.s32 2, %s2520_s25  ;;  %s1041_s26 = sadd.s32 3, %s2520_s25 }
  0x54   : > { %319 = vmatprep.subr.mxu0 %v2527_v3  ;;  %2042 = vset.pattern.permute.xlu0 %v3471_v8  ;;  %v2542_v9 = vld [vmem:[#allocation8 + $0x188] sm:$0xff]  ;;  %v2546_v10 = vld [vmem:[#allocation8 + $0x180] sm:$0xff]  ;;  %v2560_v15 = vld [vmem:[#allocation8 + $0x1d8] sm:$0xff]  ;;  %s1411_s27 = sadd.s32 5, %s2520_s25  ;;  %s1781_s28 = sadd.s32 7, %s2520_s25 }
  0x55   : > { %320 = vmatpush1.msra.mxu0 %v2530_v4  ;;  %2043 = vset.pattern.permute.xlu1 %v3471_v8  ;;  %v2551_v12 = vld [vmem:[#allocation8 + $0x168] sm:$0xff]  ;;  %v2557_v14 = vld [vmem:[#allocation8 + $0x160] sm:$0xff]  ;;  %v2562_v16 = vld [vmem:[#allocation8 + $0x1d0] sm:$0xff] }
  0x56   : > { %321 = vmatprep.subr.mxu0 %v2534_v6  ;;  %388 = vmatprep.subr.mxu1 %v2548_v11  ;;  %v2565_v17 = vld [vmem:[#allocation8 + $0x148] sm:$0xff]  ;;  %v2568_v18 = vld [vmem:[#allocation8 + $0x1b8] sm:$0xff]  ;;  %v2571_v19 = vld [vmem:[#allocation8 + $0x140] sm:$0xff] }
  0x57   : > { %322 = vmatpush1.msra.mxu0 %v2538_v7  ;;  %389 = vmatpush1.msra.mxu1 %v2554_v13  ;;  %v2574_v20 = vld [vmem:[#allocation8 + $0x1b0] sm:$0xff]  ;;  %v2576_v21 = vld [vmem:[#allocation8 + $0x198] sm:$0xff]  ;;  %v2579_v22 = vld [vmem:[#allocation8 + $0x128] sm:$0xff] }
  0x58   : > { %323 = vmatprep.subr.mxu0 %v2542_v9  ;;  %390 = vmatprep.subr.mxu1 %v2560_v15  ;;  %v2582_v23 = vld [vmem:[#allocation8 + $0x190] sm:$0xff]  ;;  %v2585_v24 = vld [vmem:[#allocation8 + $0x120] sm:$0xff]  ;;  %v2588_v25 = vld [vmem:[#allocation8 + $0x178] sm:$0xff] }
  0x59   : > { %324 = vmatpush1.msra.mxu0 %v2546_v10  ;;  %391 = vmatpush1.msra.mxu1 %v2562_v16  ;;  %v2591_v26 = vld [vmem:[#allocation8 + $0x108] sm:$0xff]  ;;  %v2594_v27 = vld [vmem:[#allocation8 + $0x170] sm:$0xff]  ;;  %v2597_v28 = vld [vmem:[#allocation8 + $0x100] sm:$0xff] }
  0x5a   : > { %325 = vmatprep.subr.mxu0 %v2551_v12  ;;  %392 = vmatprep.subr.mxu1 %v2568_v18  ;;  %v2600_v29 = vld [vmem:[#allocation8 + $0x158] sm:$0xff]  ;;  %v2603_v30 = vld [vmem:[#allocation8 + $0xe8] sm:$0xff]  ;;  %v2606_v31 = vld [vmem:[#allocation8 + $0x150] sm:$0xff] }
  0x5b   : > { %326 = vmatpush1.msra.mxu0 %v2557_v14  ;;  %393 = vmatpush1.msra.mxu1 %v2574_v20  ;;  %v2609_v32 = vld [vmem:[#allocation8 + $0xe0] sm:$0xff]  ;;  %v2612_v33 = vld [vmem:[#allocation8 + $0x138] sm:$0xff]  ;;  %v2615_v34 = vld [vmem:[#allocation8 + $0xc8] sm:$0xff] }
  0x5c   : > { %327 = vmatprep.subr.mxu0 %v2565_v17  ;;  %394 = vmatprep.subr.mxu1 %v2576_v21  ;;  %v2618_v35 = vld [vmem:[#allocation8 + $0x130] sm:$0xff]  ;;  %v2621_v36 = vld [vmem:[#allocation8 + $0xc0] sm:$0xff]  ;;  %v2624_v37 = vld [vmem:[#allocation8 + $0x118] sm:$0xff] }
  0x5d   : > { %328 = vmatpush1.msra.mxu0 %v2571_v19  ;;  %395 = vmatpush1.msra.mxu1 %v2582_v23  ;;  %v2627_v38 = vld [vmem:[#allocation8 + $0xa8] sm:$0xff]  ;;  %v2630_v39 = vld [vmem:[#allocation8 + $0x110] sm:$0xff]  ;;  %v2633_v40 = vld [vmem:[#allocation8 + $0xa0] sm:$0xff] }
  0x5e   : > { %329 = vmatprep.subr.mxu0 %v2579_v22  ;;  %396 = vmatprep.subr.mxu1 %v2588_v25  ;;  %v2636_v41 = vld [vmem:[#allocation8 + $0xf8] sm:$0xff]  ;;  %v2639_v42 = vld [vmem:[#allocation8 + $0x88] sm:$0xff]  ;;  %v2642_v43 = vld [vmem:[#allocation8 + $0xf0] sm:$0xff] }
  0x5f   : > { %330 = vmatpush1.msra.mxu0 %v2585_v24  ;;  %397 = vmatpush1.msra.mxu1 %v2594_v27  ;;  %v2645_v44 = vld [vmem:[#allocation8 + $0x80] sm:$0xff]  ;;  %v2648_v45 = vld [vmem:[#allocation8 + $0xd8] sm:$0xff]  ;;  %v2651_v46 = vld [vmem:[#allocation8 + $0x68] sm:$0xff] }
  0x60   : > { %331 = vmatprep.subr.mxu0 %v2591_v26  ;;  %398 = vmatprep.subr.mxu1 %v2600_v29  ;;  %3570 = vst [vmem:[#allocation16_spill] sm:$0xff] %v2645_v44  ;;  %3571 = vst [vmem:[#allocation17_spill] sm:$0xff] %v2651_v46  ;;  %v2654_v47 = vld [vmem:[#allocation8 + $0xd0] sm:$0xff]  ;;  %v2657_v48 = vld [vmem:[#allocation8 + $0x60] sm:$0xff] }
  0x61   : > { %332 = vmatpush1.msra.mxu0 %v2597_v28  ;;  %399 = vmatpush1.msra.mxu1 %v2606_v31  ;;  %3572 = vst [vmem:[#allocation18_spill] sm:$0xff] %v2657_v48  ;;  %v2660_v49 = vld [vmem:[#allocation8 + $0xb8] sm:$0xff]  ;;  %v2663_v50 = vld [vmem:[#allocation8 + $0x48] sm:$0xff]  ;;  %v2666_v51 = vld [vmem:[#allocation8 + $0xb0] sm:$0xff] }
  0x62   : > { %333 = vmatprep.subr.mxu0 %v2603_v30  ;;  %400 = vmatprep.subr.mxu1 %v2612_v33  ;;  %3573 = vst [vmem:[#allocation19_spill] sm:$0xff] %v2663_v50  ;;  %v2669_v52 = vld [vmem:[#allocation8 + $0x40] sm:$0xff]  ;;  %v2672_v53 = vld [vmem:[#allocation8 + $0x98] sm:$0xff]  ;;  %v2681_v56 = vld [vmem:[#allocation8 + $0x28] sm:$0xff] }
  0x63   : > { %334 = vmatpush1.msra.mxu0 %v2609_v32  ;;  %401 = vmatpush1.msra.mxu1 %v2618_v35  ;;  %3574 = vst [vmem:[#allocation20_spill] sm:$0xff] %v2669_v52  ;;  %3575 = vst [vmem:[#allocation21_spill] sm:$0xff] %v2672_v53  ;;  %v2677_v54 = vld [vmem:[%s3466_s2] sm:$0xff]  ;;  %v2684_v57 = vld [vmem:[#allocation8 + $0x90] sm:$0xff] }
  0x64   : > { %335 = vmatprep.subr.mxu0 %v2615_v34  ;;  %402 = vmatprep.subr.mxu1 %v2624_v37  ;;  %3576 = vst [vmem:[#allocation22_spill] sm:$0xff] %v2677_v54  ;;  %3577 = vst [vmem:[#allocation23_spill] sm:$0xff] %v2681_v56  ;;  %v2688_v58 = vld [vmem:[#allocation8 + $0x20] sm:$0xff]  ;;  %v2691_v59 = vld [vmem:[#allocation8 + $0x78] sm:$0xff]  ;;  %vm488_vm0 = vcmp.lt.s32.totalorder %v487_v55, %v2677_v54  ;;  %vm673_vm1 = vcmp.lt.s32.totalorder %v672_v0, %v2677_v54  ;;  %v1597_v0 = vstv %s1596_s16 }
  0x65   : > { %336 = vmatpush1.msra.mxu0 %v2621_v36  ;;  %403 = vmatpush1.msra.mxu1 %v2630_v39  ;;  %3578 = vst [vmem:[#allocation24_spill] sm:$0xff] %v2684_v57  ;;  %3579 = vst [vmem:[#allocation25_spill] sm:$0xff] %v2688_v58  ;;  %v2694_v60 = vld [vmem:[#allocation8 + $0x8] sm:$0xff]  ;;  %v2697_v61 = vld [vmem:[#allocation8 + $0x70] sm:$0xff]  ;;  %vm1598_vm3 = vcmp.lt.s32.totalorder %v1597_v0, %v2677_v54 }
  0x66   : > { %337 = vmatprep.subr.mxu0 %v2627_v38  ;;  %404 = vmatprep.subr.mxu1 %v2636_v41  ;;  %3580 = vst [vmem:[#allocation26_spill] sm:$0xff] %v2691_v59  ;;  %3581 = vst [vmem:[#allocation27_spill] sm:$0xff] %v2694_v60  ;;  %v2701_v62 = vld [vmem:[#allocation8] sm:$0xff]  ;;  %v2704_v63 = vld [vmem:[#allocation8 + $0x58] sm:$0xff] }
  0x67   : > { %338 = vmatpush1.msra.mxu0 %v2633_v40  ;;  %405 = vmatpush1.msra.mxu1 %v2642_v43  ;;  %3582 = vst [vmem:[#allocation28_spill] sm:$0xff] %v2697_v61  ;;  %3583 = vst [vmem:[#allocation29_spill] sm:$0xff] %v2701_v62  ;;  %v2707_v5 = vld [vmem:[#allocation10] sm:$0xff]  ;;  %v2710_v8 = vld [vmem:[#allocation8 + $0x50] sm:$0xff] }
  0x68   : > { %339 = vmatprep.subr.mxu0 %v2639_v42  ;;  %406 = vmatprep.subr.mxu1 %v2648_v45  ;;  %3584 = vst [vmem:[#allocation30_spill] sm:$0xff] %v2704_v63  ;;  %3585 = vst [vmem:[#allocation31_spill] sm:$0xff] %v2710_v8  ;;  %v2715_v55 = vld [vmem:[#allocation8 + $0x38] sm:$0xff] }
  0x69   : > { %340 = vmatpush1.msra.mxu0 %v2645_v44  ;;  %407 = vmatpush1.msra.mxu1 %v2654_v47  ;;  %3586 = vst [vmem:[#allocation32_spill] sm:$0xff] %v2715_v55  ;;  %v3592_v0 = vld [vmem:[#allocation19_spill] sm:$0xff] }
  0x6a   : > { %341 = vmatprep.subr.mxu0 %v2651_v46  ;;  %408 = vmatprep.subr.mxu1 %v2660_v49 }
  0x6b   : > { %342 = vmatpush1.msra.mxu0 %v2657_v48  ;;  %409 = vmatpush1.msra.mxu1 %v2666_v51 }
  0x6c   : > { %343 = vmatprep.subr.mxu0 %v2663_v50  ;;  %410 = vmatprep.subr.mxu1 %v2672_v53  ;;  %v2725_v50 = vld [vmem:[#allocation8 + $0x18] sm:$0xff] }
  0x6d   : > { %344 = vmatpush1.msra.mxu0 %v2669_v52  ;;  %411 = vmatpush1.msra.mxu1 %v2684_v57  ;;  %3589 = vst [vmem:[#allocation34_spill] sm:$0xff] %v2725_v50 }
  0x6e   : > { %345 = vmatprep.subr.mxu0 %v2681_v56  ;;  %412 = vmatprep.subr.mxu1 %v2691_v59  ;;  %v3587_v56 = vmov 0  }
  0x6f   : > { %346 = vmatpush1.msra.mxu0 %v2688_v58  ;;  %413 = vmatpush1.msra.mxu1 %v2697_v61  ;;  %v489_v52 = vsel %vm488_vm0, 1, %v3587_v56  ;;  %v2720_v58 = vld [vmem:[#allocation8 + $0x30] sm:$0xff] }
  0x70   : > { %347 = vmatprep.subr.mxu0 %v2694_v60  ;;  %414 = vmatprep.subr.mxu1 %v2704_v63  ;;  %3588 = vst [vmem:[#allocation33_spill] sm:$0xff] %v2720_v58  ;;  %v1227_v60 = vstv %s1226_s6  ;;  %v2728_v61 = vld [vmem:[#allocation8 + $0x10] sm:$0xff] }
  0x71   : > { %348 = vmatpush1.msra.mxu0 %v2701_v62  ;;  %415 = vmatpush1.msra.mxu1 %v2710_v8  ;;  %3590 = vst [vmem:[#allocation35_spill] sm:$0xff] %v2728_v61  ;;  %v674_v62 = vsel %vm673_vm1, 1, %v3587_v56  ;;  %vm1228_vm2 = vcmp.lt.s32.totalorder %v1227_v60, %v2677_v54  ;;  %v1599_v60 = vsel %vm1598_vm3, 1, %v3587_v56  ;;  %v3596_v54 = vld [vmem:[#allocation27_spill] sm:$0xff] }
  0x72   : > { %382 = vmatmul.mubr.f32.vlgmr.msra.gmra.mxu0 %v2707_v5  ;;  %416 = vmatprep.subr.mxu1 %v2715_v55 }
  0x73   : > { %491 = vperm.xlu0 %2042, %v489_v52   ;;  %417 = vmatpush1.msra.mxu1 %v2720_v58  ;;  %v1229_v52 = vsel %vm1228_vm2, 1, %v3587_v56  ;;  %v3595_v56 = vld [vmem:[#allocation25_spill] sm:$0xff] }
  0x74   : > { %501 = vmatprep.subr.mxu0 %v2523_v1  ;;  %418 = vmatprep.subr.mxu1 %v2725_v50 }
  0x75   : > { %502 = vmatpush1.msra.mxu0 %v2525_v2  ;;  %419 = vmatpush1.msra.mxu1 %v2728_v61 }
  0x76   : > { %503 = vmatprep.subr.mxu0 %v2527_v3  ;;  %453 = vmatmul.mubr.f32.vlgmr.msra.gmra.mxu1 %v2707_v5 }
  0x77   : > { %676 = vperm.xlu0 %2042, %v674_v62   ;;  %572 = vmatprep.subr.mxu1 %v2548_v11  ;;  %v3591_v62 = vld [vmem:[#allocation28_spill] sm:$0xff] }
  0x78   : > { %504 = vmatpush1.msra.mxu0 %v2530_v4  ;;  %573 = vmatpush1.msra.mxu1 %v2554_v13 }
  0x79   : > { %505 = vmatprep.subr.mxu0 %v2534_v6  ;;  %574 = vmatprep.subr.mxu1 %v2560_v15 }
  0x7a   : > { %506 = vmatpush1.msra.mxu0 %v2538_v7  ;;  %575 = vmatpush1.msra.mxu1 %v2562_v16 }
  0x7b   : > { %1231 = vperm.xlu0 %2042, %v1229_v52   ;;  %576 = vmatprep.subr.mxu1 %v2568_v18  ;;  %v3593_v52 = vld [vmem:[#allocation20_spill] sm:$0xff] }
  0x7c   : > { %507 = vmatprep.subr.mxu0 %v2542_v9  ;;  %577 = vmatpush1.msra.mxu1 %v2574_v20 }
  0x7d   : > { %508 = vmatpush1.msra.mxu0 %v2546_v10  ;;  %578 = vmatprep.subr.mxu1 %v2576_v21 }
  0x7e   : > { %509 = vmatprep.subr.mxu0 %v2551_v12  ;;  %579 = vmatpush1.msra.mxu1 %v2582_v23 }
  0x7f   : > { %1601 = vperm.xlu0 %2042, %v1599_v60   ;;  %580 = vmatprep.subr.mxu1 %v2588_v25  ;;  %v3594_v60 = vld [vmem:[#allocation23_spill] sm:$0xff] }
  0x80   : > { %510 = vmatpush1.msra.mxu0 %v2557_v14  ;;  %581 = vmatpush1.msra.mxu1 %v2594_v27 }
  0x81   : > { %511 = vmatprep.subr.mxu0 %v2565_v17  ;;  %582 = vmatprep.subr.mxu1 %v2600_v29 }
  0x82   : > { %512 = vmatpush1.msra.mxu0 %v2571_v19  ;;  %583 = vmatpush1.msra.mxu1 %v2606_v31 }
  0x83   : > { %513 = vmatprep.subr.mxu0 %v2579_v22  ;;  %584 = vmatprep.subr.mxu1 %v2612_v33 }
  0x84   : > { %514 = vmatpush1.msra.mxu0 %v2585_v24  ;;  %585 = vmatpush1.msra.mxu1 %v2618_v35 }
  0x85   : > { %515 = vmatprep.subr.mxu0 %v2591_v26  ;;  %586 = vmatprep.subr.mxu1 %v2624_v37 }
  0x86   : > { %516 = vmatpush1.msra.mxu0 %v2597_v28  ;;  %587 = vmatpush1.msra.mxu1 %v2630_v39 }
  0x87   : > { %517 = vmatprep.subr.mxu0 %v2603_v30  ;;  %588 = vmatprep.subr.mxu1 %v2636_v41 }
  0x88   : > { %518 = vmatpush1.msra.mxu0 %v2609_v32  ;;  %589 = vmatpush1.msra.mxu1 %v2642_v43 }
  0x89   : > { %519 = vmatprep.subr.mxu0 %v2615_v34  ;;  %590 = vmatprep.subr.mxu1 %v2648_v45 }
  0x8a   : > { %520 = vmatpush1.msra.mxu0 %v2621_v36  ;;  %591 = vmatpush1.msra.mxu1 %v2654_v47 }
  0x8b   : > { %521 = vmatprep.subr.mxu0 %v2627_v38  ;;  %592 = vmatprep.subr.mxu1 %v2660_v49 }
  0x8c   : > { %522 = vmatpush1.msra.mxu0 %v2633_v40  ;;  %593 = vmatpush1.msra.mxu1 %v2666_v51 }
  0x8d   : > { %523 = vmatprep.subr.mxu0 %v2639_v42  ;;  %594 = vmatprep.subr.mxu1 %v2672_v53 }
  0x8e   : > { %524 = vmatpush1.msra.mxu0 %v2645_v44  ;;  %595 = vmatpush1.msra.mxu1 %v2684_v57 }
  0x8f   : > { %525 = vmatprep.subr.mxu0 %v2651_v46  ;;  %596 = vmatprep.subr.mxu1 %v2691_v59 }
  0x90   : > { %526 = vmatpush1.msra.mxu0 %v2657_v48  ;;  %597 = vmatpush1.msra.mxu1 %v3591_v62  ;;  %v316_v62 = vld [vmem:[%s2508_s15 + $0x18] sm:$0xff]  ;;  %v315_v48 = vld [vmem:[%s2508_s15 + $0x10] sm:$0xff] }
  0x91   : > { %527 = vmatprep.subr.mxu0 %v3592_v0  ;;  %598 = vmatprep.subr.mxu1 %v2704_v63  ;;  %v3597_v0 = vld [vmem:[#allocation29_spill] sm:$0xff]  ;;  %v3598_v63 = vmov 0.0  }
  0x92   : > { %528 = vmatpush1.msra.mxu0 %v3593_v52  ;;  %599 = vmatpush1.msra.mxu1 %v2710_v8 }
  0x93   : > { %529 = vmatprep.subr.mxu0 %v3594_v60  ;;  %600 = vmatprep.subr.mxu1 %v2715_v55  ;;  %v314_v55 = vld [vmem:[%s2508_s15 + $0x8] sm:$0xff] }
  0x94   : > { %530 = vmatpush1.msra.mxu0 %v3595_v56  ;;  %601 = vmatpush1.msra.mxu1 %v2720_v58  ;;  %v313_v56 = vld [vmem:[%s2508_s15] sm:$0xff] }
  0x95   : > { %531 = vmatprep.subr.mxu0 %v3596_v54  ;;  %602 = vmatprep.subr.mxu1 %v2725_v50 }
  0x96   : > { %532 = vmatpush1.msra.mxu0 %v3597_v0  ;;  %565 = vmatprep.mubr.f32.mxu0 %v3598_v63 }
  0x97   : > { %603 = vmatpush1.msra.mxu1 %v2728_v61  ;;  %636 = vmatprep.mubr.f32.mxu1 %v3598_v63 }
  0x98   : > { %686 = vmatprep.subr.mxu0 %v2523_v1  ;;  %757 = vmatprep.subr.mxu1 %v2548_v11 }
 0x132   : > { %v383_v58 = vpop.f32.mrf.mxu0 }
 0x133   : > { %v459_v54 = vadd.f32 %v383_v58, %v313_v56 }
 0x134   : > { %v385_v60 = vpop.f32.mrf.mxu0 }
 0x135   : > { %v1906_v50 = vmul.f32 -1.442695, %v459_v54  ;;  %v460_v8 = vadd.f32 %v385_v60, %v314_v55  ;;  %v492_v55 = vpop.permute.xlu0 %491 }
 0x136   : > { %v454_v52 = vpop.f32.mrf.mxu1  ;;  %vm493_vm4 = vcmp.eq.s32.totalorder %v492_v55, 1  ;;  %v3611_v55 = vld [vmem:[#allocation32_spill] sm:$0xff] }
 0x137   : > { %2044 = vpow2.f32 %v1906_v50  ;;  %v1907_v0 = vmul.f32 -1.442695, %v460_v8  ;;  %v461_v59 = vadd.f32 %v454_v52, %v315_v48  ;;  %v312_v8 = vld [vmem:[#allocation2] sm:$0xff] }
 0x138   : > { %v456_v61 = vpop.f32.mrf.mxu1  ;;  %v3605_v52 = vld [vmem:[#allocation28_spill] sm:$0xff] }
 0x139   : > { %2046 = vpow2.f32 %v1907_v0  ;;  %v462_v63 = vadd.f32 %v456_v61, %v316_v62  ;;  %v3602_v61 = vld [vmem:[#allocation17_spill] sm:$0xff]  ;;  %v3604_v62 = vld [vmem:[#allocation18_spill] sm:$0xff] }
 0x13a   : > { %2048 = vtanh.f32 %v461_v59 }
 0x13b   : > { %v1908_v46 = vmul.f32 -1.442695, %v462_v63  ;;  %v3603_v63 = vld [vmem:[#allocation26_spill] sm:$0xff] }
 0x13d   : > { %2050 = vpow2.f32 %v1908_v46 }
 0x144   : > { %v2045_v1 = vpop.eup %2044 }
 0x145   : > { %v466_v57 = vadd.f32 1.0, %v2045_v1 }
 0x146   : > { %v2047_v11 = vpop.eup %2046 }
 0x147   : > { %2052 = vrcp.f32 %v466_v57  ;;  %v472_v56 = vadd.f32 1.0, %v2047_v11  ;;  %v2049_v54 = vpop.eup %2048 }
 0x149   : > { %2054 = vrcp.f32 %v472_v56  ;;  %v3606_v56 = vld [vmem:[#allocation19_spill] sm:$0xff] }
 0x14a   : > { %v2051_v58 = vpop.eup %2050 }
 0x14b   : > { %v479_v60 = vadd.f32 1.0, %v2051_v58  ;;  %v3608_v58 = vld [vmem:[#allocation20_spill] sm:$0xff] }
 0x14d   : > { %2056 = vrcp.f32 %v479_v60  ;;  %v3613_v60 = vld [vmem:[#allocation33_spill] sm:$0xff] }
 0x154   : > { %v2053_v50 = vpop.eup %2052 }
 0x155   : > { %v483_v53 = vmul.f32 %v2053_v50, %v2049_v54  ;;  %v3607_v54 = vld [vmem:[#allocation30_spill] sm:$0xff]  ;;  %v3609_v50 = vld [vmem:[#allocation31_spill] sm:$0xff] }
 0x156   : > { %v2055_v0 = vpop.eup %2054 }
 0x157   : > { %v482_v44 = vmul.f32 %v2055_v0, %v312_v8  ;;  %v3612_v0 = vld [vmem:[#allocation25_spill] sm:$0xff] }
 0x159   : > { %v484_v48 = vadd.f32 %v483_v53, %v482_v44  ;;  %v3600_v44 = vld [vmem:[#allocation16_spill] sm:$0xff] }
 0x15a   : > { %v2057_v59 = vpop.eup %2056  ;;  %v3601_v53 = vld [vmem:[#allocation24_spill] sm:$0xff] }
 0x15b   : > { %2058 = vtanh.f32 %v484_v48  ;;  %v2812_v1 = vsel %vm493_vm4, %v484_v48, %v312_v8  ;;  %v3610_v8 = vld [vmem:[#allocation23_spill] sm:$0xff] }
 0x15c   : > { %v3614_v48 = vld [vmem:[#allocation27_spill] sm:$0xff] }
 0x168   : > { %v2059_v46 = vpop.eup %2058 }
 0x169   : > { %v486_v57 = vmul.f32 %v2059_v46, %v2057_v59  ;;  %v3615_v59 = vld [vmem:[#allocation34_spill] sm:$0xff]  ;;  %v3616_v46 = vld [vmem:[#allocation29_spill] sm:$0xff] }
 0x16b   : > { %v2815_v11 = vsel %vm493_vm4, %v486_v57, %v2707_v5  ;;  %v3599_v5 = vld [vmem:[#allocation21_spill] sm:$0xff]  ;;  %v3617_v57 = vmov 0.0  }
 0x16c   : > { %566 = vmatmul.mubr.f32.vlgmr.msra.gmra.mxu0 %v2815_v11  ;;  %637 = vmatmul.mubr.f32.vlgmr.msra.gmra.mxu1 %v2815_v11 }
 0x16d   : > { %687 = vmatpush1.msra.mxu0 %v2525_v2  ;;  %758 = vmatpush1.msra.mxu1 %v2554_v13 }
 0x16e   : > { %688 = vmatprep.subr.mxu0 %v2527_v3  ;;  %759 = vmatprep.subr.mxu1 %v2560_v15 }
 0x16f   : > { %689 = vmatpush1.msra.mxu0 %v2530_v4  ;;  %760 = vmatpush1.msra.mxu1 %v2562_v16 }
 0x170   : > { %690 = vmatprep.subr.mxu0 %v2534_v6  ;;  %761 = vmatprep.subr.mxu1 %v2568_v18 }
 0x171   : > { %691 = vmatpush1.msra.mxu0 %v2538_v7  ;;  %762 = vmatpush1.msra.mxu1 %v2574_v20 }
 0x172   : > { %692 = vmatprep.subr.mxu0 %v2542_v9  ;;  %763 = vmatprep.subr.mxu1 %v2576_v21 }
 0x173   : > { %693 = vmatpush1.msra.mxu0 %v2546_v10  ;;  %764 = vmatpush1.msra.mxu1 %v2582_v23 }
 0x174   : > { %694 = vmatprep.subr.mxu0 %v2551_v12  ;;  %765 = vmatprep.subr.mxu1 %v2588_v25 }
 0x175   : > { %695 = vmatpush1.msra.mxu0 %v2557_v14  ;;  %766 = vmatpush1.msra.mxu1 %v2594_v27 }
 0x176   : > { %696 = vmatprep.subr.mxu0 %v2565_v17  ;;  %767 = vmatprep.subr.mxu1 %v2600_v29 }
 0x177   : > { %697 = vmatpush1.msra.mxu0 %v2571_v19  ;;  %768 = vmatpush1.msra.mxu1 %v2606_v31 }
 0x178   : > { %698 = vmatprep.subr.mxu0 %v2579_v22  ;;  %769 = vmatprep.subr.mxu1 %v2612_v33 }
 0x179   : > { %699 = vmatpush1.msra.mxu0 %v2585_v24  ;;  %770 = vmatpush1.msra.mxu1 %v2618_v35 }
 0x17a   : > { %700 = vmatprep.subr.mxu0 %v2591_v26  ;;  %771 = vmatprep.subr.mxu1 %v2624_v37 }
 0x17b   : > { %701 = vmatpush1.msra.mxu0 %v2597_v28  ;;  %772 = vmatpush1.msra.mxu1 %v2630_v39 }
 0x17c   : > { %702 = vmatprep.subr.mxu0 %v2603_v30  ;;  %773 = vmatprep.subr.mxu1 %v2636_v41 }
 0x17d   : > { %703 = vmatpush1.msra.mxu0 %v2609_v32  ;;  %774 = vmatpush1.msra.mxu1 %v2642_v43 }
 0x17e   : > { %704 = vmatprep.subr.mxu0 %v2615_v34  ;;  %775 = vmatprep.subr.mxu1 %v2648_v45 }
 0x17f   : > { %705 = vmatpush1.msra.mxu0 %v2621_v36  ;;  %776 = vmatpush1.msra.mxu1 %v2654_v47 }
 0x180   : > { %706 = vmatprep.subr.mxu0 %v2627_v38  ;;  %777 = vmatprep.subr.mxu1 %v2660_v49 }
 0x181   : > { %707 = vmatpush1.msra.mxu0 %v2633_v40  ;;  %778 = vmatpush1.msra.mxu1 %v2666_v51 }
 0x182   : > { %708 = vmatprep.subr.mxu0 %v2639_v42  ;;  %779 = vmatprep.subr.mxu1 %v3599_v5 }
 0x183   : > { %709 = vmatpush1.msra.mxu0 %v3600_v44  ;;  %780 = vmatpush1.msra.mxu1 %v3601_v53 }
 0x184   : > { %710 = vmatprep.subr.mxu0 %v3602_v61  ;;  %781 = vmatprep.subr.mxu1 %v3603_v63  ;;  %v1912_v63 = vld [vmem:[%s2508_s15 + $0x38] sm:$0xff] }
 0x185   : > { %711 = vmatpush1.msra.mxu0 %v3604_v62  ;;  %782 = vmatpush1.msra.mxu1 %v3605_v52 }
 0x186   : > { %712 = vmatprep.subr.mxu0 %v3606_v56  ;;  %783 = vmatprep.subr.mxu1 %v3607_v54 }
 0x187   : > { %713 = vmatpush1.msra.mxu0 %v3608_v58  ;;  %784 = vmatpush1.msra.mxu1 %v3609_v50  ;;  %v3618_v58 = vld [vmem:[#allocation35_spill] sm:$0xff] }
 0x188   : > { %714 = vmatprep.subr.mxu0 %v3610_v8  ;;  %785 = vmatprep.subr.mxu1 %v3611_v55  ;;  %v3619_v8 = vld [vmem:[#allocation14_spill] sm:$0xff]  ;;  %v3620_v55 = vld [vmem:[#allocation15_spill] sm:$0xff] }
 0x189   : > { %715 = vmatpush1.msra.mxu0 %v3612_v0  ;;  %786 = vmatpush1.msra.mxu1 %v3613_v60  ;;  %v857_v60 = vstv %s856_s17  ;;  %v1042_v0 = vstv %s1041_s26 }
 0x18a   : > { %716 = vmatprep.subr.mxu0 %v3614_v48  ;;  %787 = vmatprep.subr.mxu1 %v3615_v59  ;;  %v3621_v48 = vld [vmem:[#allocation22_spill] sm:$0xff] }
 0x18b   : > { %717 = vmatpush1.msra.mxu0 %v3616_v46  ;;  %750 = vmatprep.mubr.f32.mxu0 %v3617_v57  ;;  %vm858_vm5 = vcmp.lt.s32.totalorder %v857_v60, %v3621_v48  ;;  %vm1043_vm6 = vcmp.lt.s32.totalorder %v1042_v0, %v3621_v48  ;;  %v3622_v46 = vmov 0   ;;  %v1909_v60 = vld [vmem:[%s2508_s15 + $0x20] sm:$0xff] }
 0x18c   : > { %788 = vmatpush1.msra.mxu1 %v3618_v58  ;;  %821 = vmatprep.mubr.f32.mxu1 %v3617_v57  ;;  %v859_v59 = vsel %vm858_vm5, 1, %v3622_v46  ;;  %v1412_v58 = vstv %s1411_s27 }
 0x18d   : > { %871 = vmatprep.subr.mxu0 %v3619_v8  ;;  %942 = vmatprep.subr.mxu1 %v3620_v55  ;;  %v1044_v8 = vsel %vm1043_vm6, 1, %v3622_v46  ;;  %vm1413_vm7 = vcmp.lt.s32.totalorder %v1412_v58, %v3621_v48  ;;  %v1782_v55 = vstv %s1781_s28 }
 0x18e   : > { %861 = vperm.xlu1 %2043, %v859_v59   ;;  %v1414_v57 = vsel %vm1413_vm7, 1, %v3622_v46  ;;  %vm1783_vm8 = vcmp.lt.s32.totalorder %v1782_v55, %v3621_v48  ;;  %v1910_v59 = vld [vmem:[%s2508_s15 + $0x28] sm:$0xff]  ;;  %v1911_v55 = vld [vmem:[%s2508_s15 + $0x30] sm:$0xff] }
 0x18f   : > { %v1784_v0 = vsel %vm1783_vm8, 1, %v3622_v46 }
 0x192   : > { %1046 = vperm.xlu1 %2043, %v1044_v8  }
 0x196   : > { %1416 = vperm.xlu1 %2043, %v1414_v57  }
 0x19a   : > { %1786 = vperm.xlu1 %2043, %v1784_v0  }
 0x22c   : > { %v567_v50 = vpop.f32.mrf.mxu0  ;;  %v638_v58 = vpop.f32.mrf.mxu1 }
 0x22d   : > { %v643_v54 = vadd.f32 %v1909_v60, %v567_v50  ;;  %v645_v46 = vadd.f32 %v1911_v55, %v638_v58  ;;  %v3625_v55 = vld [vmem:[#allocation24_spill] sm:$0xff] }
 0x22e   : > { %v569_v56 = vpop.f32.mrf.mxu0  ;;  %v640_v61 = vpop.f32.mrf.mxu1 }
 0x22f   : > { %v1913_v52 = vmul.f32 -1.442695, %v643_v54  ;;  %v644_v62 = vadd.f32 %v1910_v59, %v569_v56  ;;  %v646_v53 = vadd.f32 %v1912_v63, %v640_v61  ;;  %v677_v61 = vpop.permute.xlu0 %676 }
 0x230   : > { %vm678_vm9 = vcmp.eq.s32.totalorder %v677_v61, 1  ;;  %v3637_v61 = vld [vmem:[#allocation33_spill] sm:$0xff] }
 0x231   : > { %2060 = vpow2.f32 %v1913_v52  ;;  %v1914_v8 = vmul.f32 -1.442695, %v644_v62  ;;  %v1915_v48 = vmul.f32 -1.442695, %v646_v53 }
 0x233   : > { %2062 = vpow2.f32 %v1914_v8 }
 0x234   : > { %2064 = vpow2.f32 %v1915_v48  ;;  %v3626_v48 = vld [vmem:[#allocation17_spill] sm:$0xff] }
 0x23e   : > { %v2061_v57 = vpop.eup %2060 }
 0x23f   : > { %v650_v44 = vadd.f32 1.0, %v2061_v57  ;;  %v3627_v57 = vld [vmem:[#allocation26_spill] sm:$0xff] }
 0x240   : > { %v2063_v0 = vpop.eup %2062 }
 0x241   : > { %2066 = vrcp.f32 %v650_v44  ;;  %v656_v5 = vadd.f32 1.0, %v2063_v0  ;;  %v2065_v54 = vpop.eup %2064  ;;  %v3629_v0 = vld [vmem:[#allocation28_spill] sm:$0xff] }
 0x242   : > { %2068 = vtanh.f32 %v645_v46  ;;  %v663_v62 = vadd.f32 1.0, %v2065_v54  ;;  %v3628_v46 = vld [vmem:[#allocation18_spill] sm:$0xff]  ;;  %v3630_v54 = vld [vmem:[#allocation19_spill] sm:$0xff] }
 0x243   : > { %2070 = vrcp.f32 %v656_v5 }
 0x244   : > { %2072 = vrcp.f32 %v663_v62  ;;  %v3634_v62 = vld [vmem:[#allocation23_spill] sm:$0xff] }
 0x24e   : > { %v2067_v56 = vpop.eup %2066 }
 0x24f   : > { %v2069_v52 = vpop.eup %2068 }
 0x250   : > { %v2071_v50 = vpop.eup %2070  ;;  %v667_v60 = vmul.f32 %v2069_v52, %v2067_v56  ;;  %v3631_v56 = vld [vmem:[#allocation30_spill] sm:$0xff]  ;;  %v3632_v52 = vld [vmem:[#allocation20_spill] sm:$0xff] }
 0x251   : > { %v666_v59 = vmul.f32 %v2071_v50, %v2812_v1  ;;  %v2073_v44 = vpop.eup %2072  ;;  %v3633_v50 = vld [vmem:[#allocation31_spill] sm:$0xff] }
 0x253   : > { %v668_v63 = vadd.f32 %v667_v60, %v666_v59  ;;  %v3635_v60 = vld [vmem:[#allocation32_spill] sm:$0xff]  ;;  %v3636_v59 = vld [vmem:[#allocation25_spill] sm:$0xff] }
 0x255   : > { %2074 = vtanh.f32 %v668_v63  ;;  %v2903_v53 = vsel %vm678_vm9, %v668_v63, %v2812_v1  ;;  %v3623_v1 = vld [vmem:[#allocation21_spill] sm:$0xff]  ;;  %v3638_v63 = vld [vmem:[#allocation27_spill] sm:$0xff] }
 0x262   : > { %v2075_v58 = vpop.eup %2074 }
 0x263   : > { %v670_v8 = vmul.f32 %v2075_v58, %v2073_v44  ;;  %v3639_v44 = vld [vmem:[#allocation34_spill] sm:$0xff]  ;;  %v3640_v58 = vld [vmem:[#allocation29_spill] sm:$0xff] }
 0x265   : > { %v2906_v5 = vsel %vm678_vm9, %v670_v8, %v2815_v11  ;;  %v3624_v11 = vld [vmem:[#allocation16_spill] sm:$0xff]  ;;  %v3641_v8 = vmov 0.0  }
 0x266   : > { %751 = vmatmul.mubr.f32.vlgmr.msra.gmra.mxu0 %v2906_v5  ;;  %822 = vmatmul.mubr.f32.vlgmr.msra.gmra.mxu1 %v2906_v5 }
 0x267   : > { %872 = vmatpush1.msra.mxu0 %v2525_v2  ;;  %943 = vmatpush1.msra.mxu1 %v2554_v13 }
 0x268   : > { %873 = vmatprep.subr.mxu0 %v2527_v3  ;;  %944 = vmatprep.subr.mxu1 %v2560_v15 }
 0x269   : > { %874 = vmatpush1.msra.mxu0 %v2530_v4  ;;  %945 = vmatpush1.msra.mxu1 %v2562_v16 }
 0x26a   : > { %875 = vmatprep.subr.mxu0 %v2534_v6  ;;  %946 = vmatprep.subr.mxu1 %v2568_v18 }
 0x26b   : > { %876 = vmatpush1.msra.mxu0 %v2538_v7  ;;  %947 = vmatpush1.msra.mxu1 %v2574_v20 }
 0x26c   : > { %877 = vmatprep.subr.mxu0 %v2542_v9  ;;  %948 = vmatprep.subr.mxu1 %v2576_v21 }
 0x26d   : > { %878 = vmatpush1.msra.mxu0 %v2546_v10  ;;  %949 = vmatpush1.msra.mxu1 %v2582_v23 }
 0x26e   : > { %879 = vmatprep.subr.mxu0 %v2551_v12  ;;  %950 = vmatprep.subr.mxu1 %v2588_v25 }
 0x26f   : > { %880 = vmatpush1.msra.mxu0 %v2557_v14  ;;  %951 = vmatpush1.msra.mxu1 %v2594_v27 }
 0x270   : > { %881 = vmatprep.subr.mxu0 %v2565_v17  ;;  %952 = vmatprep.subr.mxu1 %v2600_v29 }
 0x271   : > { %882 = vmatpush1.msra.mxu0 %v2571_v19  ;;  %953 = vmatpush1.msra.mxu1 %v2606_v31 }
 0x272   : > { %883 = vmatprep.subr.mxu0 %v2579_v22  ;;  %954 = vmatprep.subr.mxu1 %v2612_v33 }
 0x273   : > { %884 = vmatpush1.msra.mxu0 %v2585_v24  ;;  %955 = vmatpush1.msra.mxu1 %v2618_v35 }
 0x274   : > { %885 = vmatprep.subr.mxu0 %v2591_v26  ;;  %956 = vmatprep.subr.mxu1 %v2624_v37 }
 0x275   : > { %886 = vmatpush1.msra.mxu0 %v2597_v28  ;;  %957 = vmatpush1.msra.mxu1 %v2630_v39 }
 0x276   : > { %887 = vmatprep.subr.mxu0 %v2603_v30  ;;  %958 = vmatprep.subr.mxu1 %v2636_v41 }
 0x277   : > { %888 = vmatpush1.msra.mxu0 %v2609_v32  ;;  %959 = vmatpush1.msra.mxu1 %v2642_v43 }
 0x278   : > { %889 = vmatprep.subr.mxu0 %v2615_v34  ;;  %960 = vmatprep.subr.mxu1 %v2648_v45 }
 0x279   : > { %890 = vmatpush1.msra.mxu0 %v2621_v36  ;;  %961 = vmatpush1.msra.mxu1 %v2654_v47 }
 0x27a   : > { %891 = vmatprep.subr.mxu0 %v2627_v38  ;;  %962 = vmatprep.subr.mxu1 %v2660_v49 }
 0x27b   : > { %892 = vmatpush1.msra.mxu0 %v2633_v40  ;;  %963 = vmatpush1.msra.mxu1 %v2666_v51 }
 0x27c   : > { %893 = vmatprep.subr.mxu0 %v2639_v42  ;;  %964 = vmatprep.subr.mxu1 %v3623_v1 }
 0x27d   : > { %894 = vmatpush1.msra.mxu0 %v3624_v11  ;;  %965 = vmatpush1.msra.mxu1 %v3625_v55 }
 0x27e   : > { %895 = vmatprep.subr.mxu0 %v3626_v48  ;;  %966 = vmatprep.subr.mxu1 %v3627_v57 }
 0x27f   : > { %896 = vmatpush1.msra.mxu0 %v3628_v46  ;;  %967 = vmatpush1.msra.mxu1 %v3629_v0  ;;  %v1919_v46 = vld [vmem:[%s2508_s15 + $0x58] sm:$0xff] }
 0x280   : > { %897 = vmatprep.subr.mxu0 %v3630_v54  ;;  %968 = vmatprep.subr.mxu1 %v3631_v56 }
 0x281   : > { %898 = vmatpush1.msra.mxu0 %v3632_v52  ;;  %969 = vmatpush1.msra.mxu1 %v3633_v50  ;;  %v3642_v52 = vld [vmem:[#allocation35_spill] sm:$0xff]  ;;  %v1917_v50 = vld [vmem:[%s2508_s15 + $0x48] sm:$0xff] }
 0x282   : > { %899 = vmatprep.subr.mxu0 %v3634_v62  ;;  %970 = vmatprep.subr.mxu1 %v3635_v60  ;;  %v3643_v62 = vld [vmem:[#allocation14_spill] sm:$0xff]  ;;  %v3644_v60 = vld [vmem:[#allocation15_spill] sm:$0xff] }
 0x283   : > { %900 = vmatpush1.msra.mxu0 %v3636_v59  ;;  %971 = vmatpush1.msra.mxu1 %v3637_v61  ;;  %v1916_v59 = vld [vmem:[%s2508_s15 + $0x40] sm:$0xff] }
 0x284   : > { %901 = vmatprep.subr.mxu0 %v3638_v63  ;;  %972 = vmatprep.subr.mxu1 %v3639_v44 }
 0x285   : > { %902 = vmatpush1.msra.mxu0 %v3640_v58  ;;  %935 = vmatprep.mubr.f32.mxu0 %v3641_v8 }
 0x286   : > { %973 = vmatpush1.msra.mxu1 %v3642_v52  ;;  %1006 = vmatprep.mubr.f32.mxu1 %v3641_v8  ;;  %v1918_v8 = vld [vmem:[%s2508_s15 + $0x50] sm:$0xff] }
 0x287   : > { %1056 = vmatprep.subr.mxu0 %v3643_v62  ;;  %1127 = vmatprep.subr.mxu1 %v3644_v60 }
 0x326   : > { %v752_v61 = vpop.f32.mrf.mxu0  ;;  %v823_v58 = vpop.f32.mrf.mxu1 }
 0x327   : > { %v828_v63 = vadd.f32 %v1916_v59, %v752_v61  ;;  %v830_v55 = vadd.f32 %v1918_v8, %v823_v58  ;;  %v862_v61 = vpop.permute.xlu1 %861 }
 0x328   : > { %v754_v56 = vpop.f32.mrf.mxu0  ;;  %v825_v52 = vpop.f32.mrf.mxu1  ;;  %vm863_vm10 = vcmp.eq.s32.totalorder %v862_v61, 1 }
 0x329   : > { %v1920_v44 = vmul.f32 -1.442695, %v828_v63  ;;  %v829_v54 = vadd.f32 %v1917_v50, %v754_v56  ;;  %v831_v57 = vadd.f32 %v1919_v46, %v825_v52 }
 0x32b   : > { %2076 = vpow2.f32 %v1920_v44  ;;  %v1921_v0 = vmul.f32 -1.442695, %v829_v54  ;;  %v1922_v48 = vmul.f32 -1.442695, %v831_v57 }
 0x32d   : > { %2078 = vpow2.f32 %v1921_v0 }
 0x32e   : > { %2080 = vpow2.f32 %v1922_v48 }
 0x338   : > { %v2077_v62 = vpop.eup %2076 }
 0x339   : > { %v835_v11 = vadd.f32 1.0, %v2077_v62  ;;  %v1047_v62 = vpop.permute.xlu1 %1046 }
 0x33a   : > { %v2079_v60 = vpop.eup %2078  ;;  %vm1048_vm11 = vcmp.eq.s32.totalorder %v1047_v62, 1  ;;  %v3234_v62 = vld [vmem:[#allocation8 + $0x28] sm:$0xff] }
 0x33b   : > { %2082 = vrcp.f32 %v835_v11  ;;  %v841_v1 = vadd.f32 1.0, %v2079_v60  ;;  %v2081_v59 = vpop.eup %2080 }
 0x33c   : > { %2084 = vtanh.f32 %v830_v55  ;;  %v848_v0 = vadd.f32 1.0, %v2081_v59 }
 0x33d   : > { %2086 = vrcp.f32 %v841_v1 }
 0x33e   : > { %2088 = vrcp.f32 %v848_v0  ;;  %v3072_v0 = vld [vmem:[#allocation8 + $0x1e0] sm:$0xff] }
 0x348   : > { %v2083_v56 = vpop.eup %2082 }
 0x349   : > { %v2085_v50 = vpop.eup %2084 }
 0x34a   : > { %v2087_v54 = vpop.eup %2086  ;;  %v852_v46 = vmul.f32 %v2085_v50, %v2083_v56 }
 0x34b   : > { %v851_v63 = vmul.f32 %v2087_v54, %v2903_v53  ;;  %v2089_v11 = vpop.eup %2088 }
 0x34d   : > { %v853_v57 = vadd.f32 %v852_v46, %v851_v63  ;;  %v3075_v63 = vld [vmem:[#allocation8 + $0x1f0] sm:$0xff]  ;;  %v3078_v46 = vld [vmem:[#allocation8 + $0x1c8] sm:$0xff] }
 0x34f   : > { %2090 = vtanh.f32 %v853_v57  ;;  %v2982_v52 = vsel %vm863_vm10, %v853_v57, %v2903_v53  ;;  %v3081_v57 = vld [vmem:[#allocation8 + $0x1d8] sm:$0xff] }
 0x35c   : > { %v2091_v48 = vpop.eup %2090 }
 0x35d   : > { %v855_v55 = vmul.f32 %v2091_v48, %v2089_v11  ;;  %v3087_v11 = vld [vmem:[#allocation8 + $0x1d0] sm:$0xff]  ;;  %v3090_v48 = vld [vmem:[#allocation8 + $0x1a8] sm:$0xff] }
 0x35f   : > { %v2985_v1 = vsel %vm863_vm10, %v855_v55, %v2906_v5  ;;  %v3093_v55 = vld [vmem:[#allocation8 + $0x1b8] sm:$0xff] }
 0x360   : > { %936 = vmatmul.mubr.f32.vlgmr.msra.gmra.mxu0 %v2985_v1  ;;  %1007 = vmatmul.mubr.f32.vlgmr.msra.gmra.mxu1 %v2985_v1 }
 0x361   : > { %1057 = vmatpush1.msra.mxu0 %v2525_v2  ;;  %1128 = vmatpush1.msra.mxu1 %v2554_v13  ;;  %v3645_v2 = vld [vmem:[#allocation21_spill] sm:$0xff]  ;;  %v3653_v13 = vld [vmem:[#allocation30_spill] sm:$0xff] }
 0x362   : > { %1058 = vmatprep.subr.mxu0 %v2527_v3  ;;  %1129 = vmatprep.subr.mxu1 %v2560_v15  ;;  %v3646_v3 = vld [vmem:[#allocation16_spill] sm:$0xff]  ;;  %v3655_v15 = vld [vmem:[#allocation31_spill] sm:$0xff] }
 0x363   : > { %1059 = vmatpush1.msra.mxu0 %v2530_v4  ;;  %1130 = vmatpush1.msra.mxu1 %v2562_v16  ;;  %v3647_v4 = vld [vmem:[#allocation24_spill] sm:$0xff]  ;;  %v3656_v16 = vld [vmem:[#allocation23_spill] sm:$0xff]  ;;  %3678 = vst [vmem:[#allocation31_spill] sm:$0xff] %v3234_v62 }
 0x364   : > { %1060 = vmatprep.subr.mxu0 %v2534_v6  ;;  %1131 = vmatprep.subr.mxu1 %v2568_v18  ;;  %v3648_v6 = vld [vmem:[#allocation17_spill] sm:$0xff] }
 0x365   : > { %1061 = vmatpush1.msra.mxu0 %v2538_v7  ;;  %1132 = vmatpush1.msra.mxu1 %v2574_v20  ;;  %v3649_v7 = vld [vmem:[#allocation26_spill] sm:$0xff]  ;;  %v3658_v18 = vld [vmem:[#allocation25_spill] sm:$0xff]  ;;  %v3660_v20 = vld [vmem:[#allocation27_spill] sm:$0xff] }
 0x366   : > { %1062 = vmatprep.subr.mxu0 %v2542_v9  ;;  %1133 = vmatprep.subr.mxu1 %v2576_v21  ;;  %v3650_v9 = vld [vmem:[#allocation18_spill] sm:$0xff] }
 0x367   : > { %1063 = vmatpush1.msra.mxu0 %v2546_v10  ;;  %1134 = vmatpush1.msra.mxu1 %v2582_v23  ;;  %v3651_v10 = vld [vmem:[#allocation28_spill] sm:$0xff]  ;;  %v3661_v21 = vld [vmem:[#allocation34_spill] sm:$0xff]  ;;  %v3663_v23 = vmov 0.0  }
 0x368   : > { %1064 = vmatprep.subr.mxu0 %v2551_v12  ;;  %1135 = vmatprep.subr.mxu1 %v2588_v25  ;;  %v3652_v12 = vld [vmem:[#allocation19_spill] sm:$0xff]  ;;  %v3053_v25 = vld [vmem:[#allocation8 + $0x1e8] sm:$0xff] }
 0x369   : > { %1065 = vmatpush1.msra.mxu0 %v2557_v14  ;;  %1136 = vmatpush1.msra.mxu1 %v2594_v27  ;;  %v3654_v14 = vld [vmem:[#allocation20_spill] sm:$0xff]  ;;  %3665 = vst [vmem:[#allocation22_spill] sm:$0xff] %v3053_v25  ;;  %v1923_v27 = vld [vmem:[%s2508_s15 + $0x60] sm:$0xff] }
 0x36a   : > { %1066 = vmatprep.subr.mxu0 %v2565_v17  ;;  %1137 = vmatprep.subr.mxu1 %v2600_v29  ;;  %v3657_v17 = vld [vmem:[#allocation32_spill] sm:$0xff]  ;;  %v1924_v29 = vld [vmem:[%s2508_s15 + $0x68] sm:$0xff] }
 0x36b   : > { %1067 = vmatpush1.msra.mxu0 %v2571_v19  ;;  %1138 = vmatpush1.msra.mxu1 %v2606_v31  ;;  %v3659_v19 = vld [vmem:[#allocation33_spill] sm:$0xff] }
 0x36c   : > { %1068 = vmatprep.subr.mxu0 %v2579_v22  ;;  %1139 = vmatprep.subr.mxu1 %v2612_v33  ;;  %v3662_v22 = vld [vmem:[#allocation29_spill] sm:$0xff] }
 0x36d   : > { %1069 = vmatpush1.msra.mxu0 %v2585_v24  ;;  %1140 = vmatpush1.msra.mxu1 %v2618_v35  ;;  %v3664_v24 = vld [vmem:[#allocation35_spill] sm:$0xff] }
 0x36e   : > { %1070 = vmatprep.subr.mxu0 %v2591_v26  ;;  %1141 = vmatprep.subr.mxu1 %v2624_v37  ;;  %v3056_v26 = vld [vmem:[#allocation8 + $0x1f8] sm:$0xff] }
 0x36f   : > { %1071 = vmatpush1.msra.mxu0 %v2597_v28  ;;  %1142 = vmatpush1.msra.mxu1 %v2630_v39  ;;  %3666 = vst [vmem:[#allocation14_spill] sm:$0xff] %v3056_v26  ;;  %v1925_v39 = vld [vmem:[%s2508_s15 + $0x70] sm:$0xff] }
 0x370   : > { %1072 = vmatprep.subr.mxu0 %v2603_v30  ;;  %1143 = vmatprep.subr.mxu1 %v2636_v41 }
 0x371   : > { %1073 = vmatpush1.msra.mxu0 %v2609_v32  ;;  %1144 = vmatpush1.msra.mxu1 %v2642_v43 }
 0x372   : > { %1074 = vmatprep.subr.mxu0 %v2615_v34  ;;  %1145 = vmatprep.subr.mxu1 %v2648_v45 }
 0x373   : > { %1075 = vmatpush1.msra.mxu0 %v2621_v36  ;;  %1146 = vmatpush1.msra.mxu1 %v2654_v47  ;;  %v1926_v36 = vld [vmem:[%s2508_s15 + $0x78] sm:$0xff] }
 0x374   : > { %1076 = vmatprep.subr.mxu0 %v2627_v38  ;;  %1147 = vmatprep.subr.mxu1 %v2660_v49 }
 0x375   : > { %1077 = vmatpush1.msra.mxu0 %v2633_v40  ;;  %1148 = vmatpush1.msra.mxu1 %v2666_v51 }
 0x376   : > { %1078 = vmatprep.subr.mxu0 %v2639_v42  ;;  %1149 = vmatprep.subr.mxu1 %v3645_v2  ;;  %v3099_v2 = vld [vmem:[#allocation8 + $0x1b0] sm:$0xff] }
 0x377   : > { %1079 = vmatpush1.msra.mxu0 %v3646_v3  ;;  %1150 = vmatpush1.msra.mxu1 %v3647_v4  ;;  %v3102_v3 = vld [vmem:[#allocation8 + $0x188] sm:$0xff]  ;;  %v3105_v4 = vld [vmem:[#allocation8 + $0x198] sm:$0xff] }
 0x378   : > { %1080 = vmatprep.subr.mxu0 %v3648_v6  ;;  %1151 = vmatprep.subr.mxu1 %v3649_v7  ;;  %v3108_v6 = vld [vmem:[#allocation8 + $0x180] sm:$0xff]  ;;  %v3111_v7 = vld [vmem:[#allocation8 + $0x190] sm:$0xff] }
 0x379   : > { %1081 = vmatpush1.msra.mxu0 %v3650_v9  ;;  %1152 = vmatpush1.msra.mxu1 %v3651_v10  ;;  %v3114_v9 = vld [vmem:[#allocation8 + $0x168] sm:$0xff]  ;;  %v3117_v10 = vld [vmem:[#allocation8 + $0x178] sm:$0xff] }
 0x37a   : > { %1082 = vmatprep.subr.mxu0 %v3652_v12  ;;  %1153 = vmatprep.subr.mxu1 %v3653_v13  ;;  %v3120_v12 = vld [vmem:[#allocation8 + $0x160] sm:$0xff]  ;;  %v3123_v13 = vld [vmem:[#allocation8 + $0x170] sm:$0xff] }
 0x37b   : > { %1083 = vmatpush1.msra.mxu0 %v3654_v14  ;;  %1154 = vmatpush1.msra.mxu1 %v3655_v15  ;;  %v3126_v14 = vld [vmem:[#allocation8 + $0x148] sm:$0xff]  ;;  %v3129_v15 = vld [vmem:[#allocation8 + $0x158] sm:$0xff] }
 0x37c   : > { %1084 = vmatprep.subr.mxu0 %v3656_v16  ;;  %1155 = vmatprep.subr.mxu1 %v3657_v17  ;;  %v3132_v16 = vld [vmem:[#allocation8 + $0x140] sm:$0xff]  ;;  %v3135_v17 = vld [vmem:[#allocation8 + $0x150] sm:$0xff] }
 0x37d   : > { %1085 = vmatpush1.msra.mxu0 %v3658_v18  ;;  %1156 = vmatpush1.msra.mxu1 %v3659_v19  ;;  %v3138_v18 = vld [vmem:[#allocation8 + $0x128] sm:$0xff]  ;;  %v3141_v19 = vld [vmem:[#allocation8 + $0x138] sm:$0xff] }
 0x37e   : > { %1086 = vmatprep.subr.mxu0 %v3660_v20  ;;  %1157 = vmatprep.subr.mxu1 %v3661_v21  ;;  %v3144_v20 = vld [vmem:[#allocation8 + $0x120] sm:$0xff]  ;;  %v3147_v21 = vld [vmem:[#allocation8 + $0x130] sm:$0xff] }
 0x37f   : > { %1087 = vmatpush1.msra.mxu0 %v3662_v22  ;;  %1120 = vmatprep.mubr.f32.mxu0 %v3663_v23  ;;  %v3150_v22 = vld [vmem:[#allocation8 + $0x108] sm:$0xff] }
 0x380   : > { %1158 = vmatpush1.msra.mxu1 %v3664_v24  ;;  %1191 = vmatprep.mubr.f32.mxu1 %v3663_v23  ;;  %v3153_v24 = vld [vmem:[#allocation8 + $0x118] sm:$0xff] }
 0x381   : > { %1241 = vmatprep.subr.mxu0 %v3053_v25  ;;  %1312 = vmatprep.subr.mxu1 %v3056_v26 }
 0x420   : > { %v937_v28 = vpop.f32.mrf.mxu0  ;;  %v1008_v34 = vpop.f32.mrf.mxu1 }
 0x421   : > { %v1013_v30 = vadd.f32 %v1923_v27, %v937_v28  ;;  %v1015_v42 = vadd.f32 %v1925_v39, %v1008_v34  ;;  %v3156_v27 = vld [vmem:[#allocation8 + $0x100] sm:$0xff]  ;;  %v3159_v28 = vld [vmem:[#allocation8 + $0x110] sm:$0xff]  ;;  %v3177_v34 = vld [vmem:[#allocation8 + $0xd8] sm:$0xff] }
 0x422   : > { %v939_v31 = vpop.f32.mrf.mxu0  ;;  %v1010_v37 = vpop.f32.mrf.mxu1  ;;  %v3192_v39 = vld [vmem:[#allocation8 + $0xa0] sm:$0xff] }
 0x423   : > { %v1927_v32 = vmul.f32 -1.442695, %v1013_v30  ;;  %v1014_v33 = vadd.f32 %v1924_v29, %v939_v31  ;;  %v1016_v38 = vadd.f32 %v1926_v36, %v1010_v37  ;;  %v3162_v29 = vld [vmem:[#allocation8 + $0xe8] sm:$0xff]  ;;  %v3165_v30 = vld [vmem:[#allocation8 + $0xf8] sm:$0xff]  ;;  %v3168_v31 = vld [vmem:[#allocation8 + $0xe0] sm:$0xff] }
 0x424   : > { %v3183_v36 = vld [vmem:[#allocation8 + $0xd0] sm:$0xff]  ;;  %v3186_v37 = vld [vmem:[#allocation8 + $0xa8] sm:$0xff] }
 0x425   : > { %2092 = vpow2.f32 %v1927_v32  ;;  %v1928_v35 = vmul.f32 -1.442695, %v1014_v33  ;;  %v1929_v40 = vmul.f32 -1.442695, %v1016_v38  ;;  %v3171_v32 = vld [vmem:[#allocation8 + $0xf0] sm:$0xff]  ;;  %v3174_v33 = vld [vmem:[#allocation8 + $0xc8] sm:$0xff] }
 0x426   : > { %v3189_v38 = vld [vmem:[#allocation8 + $0xb8] sm:$0xff] }
 0x427   : > { %2094 = vpow2.f32 %v1928_v35  ;;  %v3180_v35 = vld [vmem:[#allocation8 + $0xc0] sm:$0xff] }
 0x428   : > { %2096 = vpow2.f32 %v1929_v40  ;;  %v3195_v40 = vld [vmem:[#allocation8 + $0xb0] sm:$0xff] }
 0x432   : > { %v2093_v41 = vpop.eup %2092 }
 0x433   : > { %v1020_v43 = vadd.f32 1.0, %v2093_v41  ;;  %v3198_v41 = vld [vmem:[#allocation8 + $0x88] sm:$0xff] }
 0x434   : > { %v2095_v45 = vpop.eup %2094 }
 0x435   : > { %2098 = vrcp.f32 %v1020_v43  ;;  %v1026_v47 = vadd.f32 1.0, %v2095_v45  ;;  %v2097_v49 = vpop.eup %2096  ;;  %v3204_v43 = vld [vmem:[#allocation8 + $0x80] sm:$0xff]  ;;  %v3207_v45 = vld [vmem:[#allocation8 + $0x90] sm:$0xff] }
 0x436   : > { %2100 = vtanh.f32 %v1015_v42  ;;  %v1033_v44 = vadd.f32 1.0, %v2097_v49  ;;  %v3201_v42 = vld [vmem:[#allocation8 + $0x98] sm:$0xff]  ;;  %3668 = vst [vmem:[#allocation21_spill] sm:$0xff] %v3204_v43  ;;  %3669 = vst [vmem:[#allocation16_spill] sm:$0xff] %v3207_v45 }
 0x437   : > { %2102 = vrcp.f32 %v1026_v47  ;;  %3667 = vst [vmem:[#allocation15_spill] sm:$0xff] %v3201_v42  ;;  %v3210_v47 = vld [vmem:[#allocation8 + $0x68] sm:$0xff]  ;;  %v3213_v49 = vld [vmem:[#allocation8 + $0x78] sm:$0xff] }
 0x438   : > { %2104 = vrcp.f32 %v1033_v44  ;;  %3670 = vst [vmem:[#allocation24_spill] sm:$0xff] %v3210_v47  ;;  %3671 = vst [vmem:[#allocation17_spill] sm:$0xff] %v3213_v49  ;;  %v3225_v44 = vld [vmem:[#allocation8 + $0x58] sm:$0xff] }
 0x439   : > { %3675 = vst [vmem:[#allocation19_spill] sm:$0xff] %v3225_v44 }
 0x442   : > { %v2099_v51 = vpop.eup %2098 }
 0x443   : > { %v2101_v53 = vpop.eup %2100 }
 0x444   : > { %v2103_v5 = vpop.eup %2102  ;;  %v1037_v58 = vmul.f32 %v2101_v53, %v2099_v51  ;;  %v3216_v51 = vld [vmem:[#allocation8 + $0x60] sm:$0xff]  ;;  %v3219_v53 = vld [vmem:[#allocation8 + $0x70] sm:$0xff] }
 0x445   : > { %v1036_v8 = vmul.f32 %v2103_v5, %v2982_v52  ;;  %v2105_v56 = vpop.eup %2104  ;;  %3672 = vst [vmem:[#allocation26_spill] sm:$0xff] %v3216_v51  ;;  %3673 = vst [vmem:[#allocation18_spill] sm:$0xff] %v3219_v53  ;;  %v3222_v5 = vld [vmem:[#allocation8 + $0x48] sm:$0xff] }
 0x446   : > { %3674 = vst [vmem:[#allocation28_spill] sm:$0xff] %v3222_v5 }
 0x447   : > { %v1038_v60 = vadd.f32 %v1037_v58, %v1036_v8  ;;  %v3228_v58 = vld [vmem:[#allocation8 + $0x40] sm:$0xff]  ;;  %v3231_v8 = vld [vmem:[#allocation8 + $0x50] sm:$0xff] }
 0x448   : > { %3676 = vst [vmem:[#allocation30_spill] sm:$0xff] %v3228_v58  ;;  %3677 = vst [vmem:[#allocation20_spill] sm:$0xff] %v3231_v8 }
 0x449   : > { %2106 = vtanh.f32 %v1038_v60  ;;  %v3065_v59 = vsel %vm1048_vm11, %v1038_v60, %v2982_v52  ;;  %v3084_v52 = vld [vmem:[#allocation8 + $0x1c0] sm:$0xff]  ;;  %v3237_v60 = vld [vmem:[#allocation8 + $0x38] sm:$0xff] }
 0x44a   : > { %3679 = vst [vmem:[#allocation23_spill] sm:$0xff] %v3237_v60 }
 0x456   : > { %v2107_v50 = vpop.eup %2106 }
 0x457   : > { %v1040_v61 = vmul.f32 %v2107_v50, %v2105_v56  ;;  %v3240_v56 = vld [vmem:[#allocation8 + $0x20] sm:$0xff]  ;;  %v3243_v50 = vld [vmem:[#allocation8 + $0x30] sm:$0xff] }
 0x458   : > { %3680 = vst [vmem:[#allocation32_spill] sm:$0xff] %v3240_v56  ;;  %3681 = vst [vmem:[#allocation25_spill] sm:$0xff] %v3243_v50 }
 0x459   : > { %v3068_v54 = vsel %vm1048_vm11, %v1040_v61, %v2985_v1  ;;  %v3096_v1 = vld [vmem:[#allocation8 + $0x1a0] sm:$0xff]  ;;  %v3246_v61 = vld [vmem:[#allocation8 + $0x8] sm:$0xff] }
 0x45a   : > { %1121 = vmatmul.mubr.f32.vlgmr.msra.gmra.mxu0 %v3068_v54  ;;  %1192 = vmatmul.mubr.f32.vlgmr.msra.gmra.mxu1 %v3068_v54  ;;  %3682 = vst [vmem:[#allocation33_spill] sm:$0xff] %v3246_v61 }
 0x45b   : > { %1242 = vmatpush1.msra.mxu0 %v3072_v0  ;;  %1313 = vmatpush1.msra.mxu1 %v3075_v63 }
 0x45c   : > { %1243 = vmatprep.subr.mxu0 %v3078_v46  ;;  %1314 = vmatprep.subr.mxu1 %v3081_v57 }
 0x45d   : > { %1244 = vmatpush1.msra.mxu0 %v3084_v52  ;;  %1315 = vmatpush1.msra.mxu1 %v3087_v11 }
 0x45e   : > { %1245 = vmatprep.subr.mxu0 %v3090_v48  ;;  %1316 = vmatprep.subr.mxu1 %v3093_v55 }
 0x45f   : > { %1246 = vmatpush1.msra.mxu0 %v3096_v1  ;;  %1317 = vmatpush1.msra.mxu1 %v3099_v2 }
 0x460   : > { %1247 = vmatprep.subr.mxu0 %v3102_v3  ;;  %1318 = vmatprep.subr.mxu1 %v3105_v4 }
 0x461   : > { %1248 = vmatpush1.msra.mxu0 %v3108_v6  ;;  %1319 = vmatpush1.msra.mxu1 %v3111_v7 }
 0x462   : > { %1249 = vmatprep.subr.mxu0 %v3114_v9  ;;  %1320 = vmatprep.subr.mxu1 %v3117_v10 }
 0x463   : > { %1250 = vmatpush1.msra.mxu0 %v3120_v12  ;;  %1321 = vmatpush1.msra.mxu1 %v3123_v13 }
 0x464   : > { %1251 = vmatprep.subr.mxu0 %v3126_v14  ;;  %1322 = vmatprep.subr.mxu1 %v3129_v15 }
 0x465   : > { %1252 = vmatpush1.msra.mxu0 %v3132_v16  ;;  %1323 = vmatpush1.msra.mxu1 %v3135_v17 }
 0x466   : > { %1253 = vmatprep.subr.mxu0 %v3138_v18  ;;  %1324 = vmatprep.subr.mxu1 %v3141_v19 }
 0x467   : > { %1254 = vmatpush1.msra.mxu0 %v3144_v20  ;;  %1325 = vmatpush1.msra.mxu1 %v3147_v21 }
 0x468   : > { %1255 = vmatprep.subr.mxu0 %v3150_v22  ;;  %1326 = vmatprep.subr.mxu1 %v3153_v24 }
 0x469   : > { %1256 = vmatpush1.msra.mxu0 %v3156_v27  ;;  %1327 = vmatpush1.msra.mxu1 %v3159_v28 }
 0x46a   : > { %1257 = vmatprep.subr.mxu0 %v3162_v29  ;;  %1328 = vmatprep.subr.mxu1 %v3165_v30 }
 0x46b   : > { %1258 = vmatpush1.msra.mxu0 %v3168_v31  ;;  %1329 = vmatpush1.msra.mxu1 %v3171_v32 }
 0x46c   : > { %1259 = vmatprep.subr.mxu0 %v3174_v33  ;;  %1330 = vmatprep.subr.mxu1 %v3177_v34 }
 0x46d   : > { %1260 = vmatpush1.msra.mxu0 %v3180_v35  ;;  %1331 = vmatpush1.msra.mxu1 %v3183_v36 }
 0x46e   : > { %1261 = vmatprep.subr.mxu0 %v3186_v37  ;;  %1332 = vmatprep.subr.mxu1 %v3189_v38 }
 0x46f   : > { %1262 = vmatpush1.msra.mxu0 %v3192_v39  ;;  %1333 = vmatpush1.msra.mxu1 %v3195_v40 }
 0x470   : > { %1263 = vmatprep.subr.mxu0 %v3198_v41  ;;  %1334 = vmatprep.subr.mxu1 %v3201_v42 }
 0x471   : > { %1264 = vmatpush1.msra.mxu0 %v3204_v43  ;;  %1335 = vmatpush1.msra.mxu1 %v3207_v45 }
 0x472   : > { %1265 = vmatprep.subr.mxu0 %v3210_v47  ;;  %1336 = vmatprep.subr.mxu1 %v3213_v49 }
 0x473   : > { %1266 = vmatpush1.msra.mxu0 %v3216_v51  ;;  %1337 = vmatpush1.msra.mxu1 %v3219_v53  ;;  %v1933_v51 = vld [vmem:[%s2508_s15 + $0x98] sm:$0xff] }
 0x474   : > { %1267 = vmatprep.subr.mxu0 %v3222_v5  ;;  %1338 = vmatprep.subr.mxu1 %v3225_v44 }
 0x475   : > { %1268 = vmatpush1.msra.mxu0 %v3228_v58  ;;  %1339 = vmatpush1.msra.mxu1 %v3231_v8  ;;  %v3249_v8 = vld [vmem:[#allocation8 + $0x18] sm:$0xff] }
 0x476   : > { %1269 = vmatprep.subr.mxu0 %v3234_v62  ;;  %1340 = vmatprep.subr.mxu1 %v3237_v60  ;;  %3683 = vst [vmem:[#allocation27_spill] sm:$0xff] %v3249_v8  ;;  %v3252_v62 = vld [vmem:[#allocation8] sm:$0xff] }
 0x477   : > { %1270 = vmatpush1.msra.mxu0 %v3240_v56  ;;  %1341 = vmatpush1.msra.mxu1 %v3243_v50  ;;  %3684 = vst [vmem:[#allocation34_spill] sm:$0xff] %v3252_v62  ;;  %v3256_v56 = vld [vmem:[#allocation8 + $0x10] sm:$0xff]  ;;  %v1931_v50 = vld [vmem:[%s2508_s15 + $0x88] sm:$0xff] }
 0x478   : > { %1271 = vmatprep.subr.mxu0 %v3246_v61  ;;  %1342 = vmatprep.subr.mxu1 %v3249_v8  ;;  %3685 = vst [vmem:[#allocation29_spill] sm:$0xff] %v3256_v56  ;;  %v1930_v61 = vld [vmem:[%s2508_s15 + $0x80] sm:$0xff] }
 0x479   : > { %1272 = vmatpush1.msra.mxu0 %v3252_v62  ;;  %1305 = vmatprep.mubr.f32.mxu0 %v3663_v23 }
 0x47a   : > { %1343 = vmatpush1.msra.mxu1 %v3256_v56  ;;  %1376 = vmatprep.mubr.f32.mxu1 %v3663_v23  ;;  %v1932_v23 = vld [vmem:[%s2508_s15 + $0x90] sm:$0xff] }
 0x47b   : > { %1426 = vmatprep.subr.mxu0 %v3053_v25  ;;  %1497 = vmatprep.subr.mxu1 %v3056_v26 }
 0x51a   : > { %v1122_v8 = vpop.f32.mrf.mxu0  ;;  %v1193_v5 = vpop.f32.mrf.mxu1 }
 0x51b   : > { %v1198_v60 = vadd.f32 %v1930_v61, %v1122_v8  ;;  %v1200_v45 = vadd.f32 %v1932_v23, %v1193_v5  ;;  %v3691_v5 = vld [vmem:[#allocation26_spill] sm:$0xff] }
 0x51c   : > { %v1124_v58 = vpop.f32.mrf.mxu0  ;;  %v1195_v56 = vpop.f32.mrf.mxu1  ;;  %v3692_v61 = vld [vmem:[#allocation18_spill] sm:$0xff] }
 0x51d   : > { %v1934_v62 = vmul.f32 -1.442695, %v1198_v60  ;;  %v1199_v44 = vadd.f32 %v1931_v50, %v1124_v58  ;;  %v1201_v49 = vadd.f32 %v1933_v51, %v1195_v56  ;;  %v1232_v51 = vpop.permute.xlu0 %1231 }
 0x51e   : > { %vm1233_vm12 = vcmp.eq.s32.totalorder %v1232_v51, 1  ;;  %v3700_v51 = vld [vmem:[#allocation25_spill] sm:$0xff] }
 0x51f   : > { %2108 = vpow2.f32 %v1934_v62  ;;  %v1935_v53 = vmul.f32 -1.442695, %v1199_v44  ;;  %v1936_v47 = vmul.f32 -1.442695, %v1201_v49  ;;  %v3690_v49 = vld [vmem:[#allocation17_spill] sm:$0xff] }
 0x521   : > { %2110 = vpow2.f32 %v1935_v53 }
 0x522   : > { %2112 = vpow2.f32 %v1936_v47  ;;  %v3689_v47 = vld [vmem:[#allocation24_spill] sm:$0xff] }
 0x52c   : > { %v2109_v25 = vpop.eup %2108 }
 0x52d   : > { %v1205_v43 = vadd.f32 1.0, %v2109_v25 }
 0x52e   : > { %v2111_v26 = vpop.eup %2110 }
 0x52f   : > { %2114 = vrcp.f32 %v1205_v43  ;;  %v1211_v42 = vadd.f32 1.0, %v2111_v26  ;;  %v2113_v8 = vpop.eup %2112 }
 0x530   : > { %2116 = vtanh.f32 %v1200_v45  ;;  %v1218_v44 = vadd.f32 1.0, %v2113_v8  ;;  %v3688_v45 = vld [vmem:[#allocation16_spill] sm:$0xff] }
 0x531   : > { %2118 = vrcp.f32 %v1211_v42  ;;  %v3693_v8 = vld [vmem:[#allocation28_spill] sm:$0xff] }
 0x532   : > { %2120 = vrcp.f32 %v1218_v44  ;;  %v3697_v44 = vld [vmem:[#allocation31_spill] sm:$0xff] }
 0x53c   : > { %v2115_v58 = vpop.eup %2114 }
 0x53d   : > { %v2117_v62 = vpop.eup %2116 }
 0x53e   : > { %v2119_v60 = vpop.eup %2118  ;;  %v1222_v53 = vmul.f32 %v2117_v62, %v2115_v58  ;;  %v3694_v58 = vld [vmem:[#allocation19_spill] sm:$0xff]  ;;  %v3695_v62 = vld [vmem:[#allocation30_spill] sm:$0xff] }
 0x53f   : > { %v1221_v50 = vmul.f32 %v2119_v60, %v3065_v59  ;;  %v2121_v25 = vpop.eup %2120  ;;  %v3696_v60 = vld [vmem:[#allocation20_spill] sm:$0xff] }
 0x541   : > { %v1223_v56 = vadd.f32 %v1222_v53, %v1221_v50  ;;  %v3698_v53 = vld [vmem:[#allocation23_spill] sm:$0xff]  ;;  %v3699_v50 = vld [vmem:[#allocation32_spill] sm:$0xff] }
 0x543   : > { %2122 = vtanh.f32 %v1223_v56  ;;  %v3268_v23 = vsel %vm1233_vm12, %v1223_v56, %v3065_v59  ;;  %v3686_v59 = vld [vmem:[#allocation15_spill] sm:$0xff]  ;;  %v3701_v56 = vld [vmem:[#allocation33_spill] sm:$0xff] }
 0x550   : > { %v2123_v26 = vpop.eup %2122 }
 0x551   : > { %v1225_v43 = vmul.f32 %v2123_v26, %v2121_v25  ;;  %v3702_v25 = vld [vmem:[#allocation27_spill] sm:$0xff]  ;;  %v3703_v26 = vld [vmem:[#allocation34_spill] sm:$0xff] }
 0x553   : > { %v3271_v42 = vsel %vm1233_vm12, %v1225_v43, %v3068_v54  ;;  %v3687_v54 = vld [vmem:[#allocation21_spill] sm:$0xff]  ;;  %v3704_v43 = vmov 0.0  }
 0x554   : > { %1306 = vmatmul.mubr.f32.vlgmr.msra.gmra.mxu0 %v3271_v42  ;;  %1377 = vmatmul.mubr.f32.vlgmr.msra.gmra.mxu1 %v3271_v42 }
 0x555   : > { %1427 = vmatpush1.msra.mxu0 %v3072_v0  ;;  %1498 = vmatpush1.msra.mxu1 %v3075_v63 }
 0x556   : > { %1428 = vmatprep.subr.mxu0 %v3078_v46  ;;  %1499 = vmatprep.subr.mxu1 %v3081_v57 }
 0x557   : > { %1429 = vmatpush1.msra.mxu0 %v3084_v52  ;;  %1500 = vmatpush1.msra.mxu1 %v3087_v11 }
 0x558   : > { %1430 = vmatprep.subr.mxu0 %v3090_v48  ;;  %1501 = vmatprep.subr.mxu1 %v3093_v55 }
 0x559   : > { %1431 = vmatpush1.msra.mxu0 %v3096_v1  ;;  %1502 = vmatpush1.msra.mxu1 %v3099_v2 }
 0x55a   : > { %1432 = vmatprep.subr.mxu0 %v3102_v3  ;;  %1503 = vmatprep.subr.mxu1 %v3105_v4 }
 0x55b   : > { %1433 = vmatpush1.msra.mxu0 %v3108_v6  ;;  %1504 = vmatpush1.msra.mxu1 %v3111_v7 }
 0x55c   : > { %1434 = vmatprep.subr.mxu0 %v3114_v9  ;;  %1505 = vmatprep.subr.mxu1 %v3117_v10 }
 0x55d   : > { %1435 = vmatpush1.msra.mxu0 %v3120_v12  ;;  %1506 = vmatpush1.msra.mxu1 %v3123_v13 }
 0x55e   : > { %1436 = vmatprep.subr.mxu0 %v3126_v14  ;;  %1507 = vmatprep.subr.mxu1 %v3129_v15 }
 0x55f   : > { %1437 = vmatpush1.msra.mxu0 %v3132_v16  ;;  %1508 = vmatpush1.msra.mxu1 %v3135_v17 }
 0x560   : > { %1438 = vmatprep.subr.mxu0 %v3138_v18  ;;  %1509 = vmatprep.subr.mxu1 %v3141_v19 }
 0x561   : > { %1439 = vmatpush1.msra.mxu0 %v3144_v20  ;;  %1510 = vmatpush1.msra.mxu1 %v3147_v21 }
 0x562   : > { %1440 = vmatprep.subr.mxu0 %v3150_v22  ;;  %1511 = vmatprep.subr.mxu1 %v3153_v24 }
 0x563   : > { %1441 = vmatpush1.msra.mxu0 %v3156_v27  ;;  %1512 = vmatpush1.msra.mxu1 %v3159_v28 }
 0x564   : > { %1442 = vmatprep.subr.mxu0 %v3162_v29  ;;  %1513 = vmatprep.subr.mxu1 %v3165_v30 }
 0x565   : > { %1443 = vmatpush1.msra.mxu0 %v3168_v31  ;;  %1514 = vmatpush1.msra.mxu1 %v3171_v32 }
 0x566   : > { %1444 = vmatprep.subr.mxu0 %v3174_v33  ;;  %1515 = vmatprep.subr.mxu1 %v3177_v34 }
 0x567   : > { %1445 = vmatpush1.msra.mxu0 %v3180_v35  ;;  %1516 = vmatpush1.msra.mxu1 %v3183_v36 }
 0x568   : > { %1446 = vmatprep.subr.mxu0 %v3186_v37  ;;  %1517 = vmatprep.subr.mxu1 %v3189_v38 }
 0x569   : > { %1447 = vmatpush1.msra.mxu0 %v3192_v39  ;;  %1518 = vmatpush1.msra.mxu1 %v3195_v40 }
 0x56a   : > { %1448 = vmatprep.subr.mxu0 %v3198_v41  ;;  %1519 = vmatprep.subr.mxu1 %v3686_v59 }
 0x56b   : > { %1449 = vmatpush1.msra.mxu0 %v3687_v54  ;;  %1520 = vmatpush1.msra.mxu1 %v3688_v45 }
 0x56c   : > { %1450 = vmatprep.subr.mxu0 %v3689_v47  ;;  %1521 = vmatprep.subr.mxu1 %v3690_v49 }
 0x56d   : > { %1451 = vmatpush1.msra.mxu0 %v3691_v5  ;;  %1522 = vmatpush1.msra.mxu1 %v3692_v61  ;;  %v1940_v5 = vld [vmem:[%s2508_s15 + $0xb8] sm:$0xff] }
 0x56e   : > { %1452 = vmatprep.subr.mxu0 %v3693_v8  ;;  %1523 = vmatprep.subr.mxu1 %v3694_v58 }
 0x56f   : > { %1453 = vmatpush1.msra.mxu0 %v3695_v62  ;;  %1524 = vmatpush1.msra.mxu1 %v3696_v60  ;;  %v3705_v62 = vld [vmem:[#allocation29_spill] sm:$0xff]  ;;  %v1938_v60 = vld [vmem:[%s2508_s15 + $0xa8] sm:$0xff] }
 0x570   : > { %1454 = vmatprep.subr.mxu0 %v3697_v44  ;;  %1525 = vmatprep.subr.mxu1 %v3698_v53  ;;  %v3706_v44 = vld [vmem:[#allocation22_spill] sm:$0xff] }
 0x571   : > { %1455 = vmatpush1.msra.mxu0 %v3699_v50  ;;  %1526 = vmatpush1.msra.mxu1 %v3700_v51  ;;  %v3707_v53 = vld [vmem:[#allocation14_spill] sm:$0xff]  ;;  %v1937_v50 = vld [vmem:[%s2508_s15 + $0xa0] sm:$0xff] }
 0x572   : > { %1456 = vmatprep.subr.mxu0 %v3701_v56  ;;  %1527 = vmatprep.subr.mxu1 %v3702_v25 }
 0x573   : > { %1457 = vmatpush1.msra.mxu0 %v3703_v26  ;;  %1490 = vmatprep.mubr.f32.mxu0 %v3704_v43 }
 0x574   : > { %1528 = vmatpush1.msra.mxu1 %v3705_v62  ;;  %1561 = vmatprep.mubr.f32.mxu1 %v3704_v43  ;;  %v1939_v43 = vld [vmem:[%s2508_s15 + $0xb0] sm:$0xff] }
 0x575   : > { %1611 = vmatprep.subr.mxu0 %v3706_v44  ;;  %1682 = vmatprep.subr.mxu1 %v3707_v53 }
 0x614   : > { %v1307_v51 = vpop.f32.mrf.mxu0  ;;  %v1378_v26 = vpop.f32.mrf.mxu1 }
 0x615   : > { %v1383_v56 = vadd.f32 %v1937_v50, %v1307_v51  ;;  %v1385_v45 = vadd.f32 %v1939_v43, %v1378_v26 }
 0x616   : > { %v1309_v58 = vpop.f32.mrf.mxu0  ;;  %v1380_v62 = vpop.f32.mrf.mxu1 }
 0x617   : > { %v1941_v25 = vmul.f32 -1.442695, %v1383_v56  ;;  %v1384_v8 = vadd.f32 %v1938_v60, %v1309_v58  ;;  %v1386_v49 = vadd.f32 %v1940_v5, %v1380_v62  ;;  %v1417_v5 = vpop.permute.xlu1 %1416 }
 0x618   : > { %vm1418_vm13 = vcmp.eq.s32.totalorder %v1417_v5, 1 }
 0x619   : > { %2124 = vpow2.f32 %v1941_v25  ;;  %v1942_v61 = vmul.f32 -1.442695, %v1384_v8  ;;  %v1943_v47 = vmul.f32 -1.442695, %v1386_v49 }
 0x61b   : > { %2126 = vpow2.f32 %v1942_v61 }
 0x61c   : > { %2128 = vpow2.f32 %v1943_v47 }
 0x626   : > { %v2125_v44 = vpop.eup %2124 }
 0x627   : > { %v1390_v54 = vadd.f32 1.0, %v2125_v44 }
 0x628   : > { %v2127_v53 = vpop.eup %2126 }
 0x629   : > { %2130 = vrcp.f32 %v1390_v54  ;;  %v1396_v59 = vadd.f32 1.0, %v2127_v53  ;;  %v2129_v50 = vpop.eup %2128 }
 0x62a   : > { %2132 = vtanh.f32 %v1385_v45  ;;  %v1403_v8 = vadd.f32 1.0, %v2129_v50 }
 0x62b   : > { %2134 = vrcp.f32 %v1396_v59 }
 0x62c   : > { %2136 = vrcp.f32 %v1403_v8 }
 0x636   : > { %v2131_v58 = vpop.eup %2130 }
 0x637   : > { %v2133_v60 = vpop.eup %2132 }
 0x638   : > { %v2135_v51 = vpop.eup %2134  ;;  %v1407_v61 = vmul.f32 %v2133_v60, %v2131_v58 }
 0x639   : > { %v1406_v56 = vmul.f32 %v2135_v51, %v3268_v23  ;;  %v2137_v54 = vpop.eup %2136  ;;  %v1951_v51 = vld [vmem:[%s2508_s15 + $0xe0] sm:$0xff] }
 0x63b   : > { %v1408_v62 = vadd.f32 %v1407_v61, %v1406_v56  ;;  %v1952_v61 = vld [vmem:[%s2508_s15 + $0xe8] sm:$0xff] }
 0x63d   : > { %2138 = vtanh.f32 %v1408_v62  ;;  %v3347_v49 = vsel %vm1418_vm13, %v1408_v62, %v3268_v23 }
 0x64a   : > { %v2139_v47 = vpop.eup %2138 }
 0x64b   : > { %v1410_v45 = vmul.f32 %v2139_v47, %v2137_v54 }
 0x64d   : > { %v3350_v59 = vsel %vm1418_vm13, %v1410_v45, %v3271_v42  ;;  %v1602_v42 = vpop.permute.xlu0 %1601 }
 0x64e   : > { %1491 = vmatmul.mubr.f32.vlgmr.msra.gmra.mxu0 %v3350_v59  ;;  %1562 = vmatmul.mubr.f32.vlgmr.msra.gmra.mxu1 %v3350_v59  ;;  %vm1603_vm14 = vcmp.eq.s32.totalorder %v1602_v42, 1 }
 0x64f   : > { %1612 = vmatpush1.msra.mxu0 %v3072_v0  ;;  %1683 = vmatpush1.msra.mxu1 %v3075_v63  ;;  %v3708_v0 = vld [vmem:[#allocation15_spill] sm:$0xff]  ;;  %v3709_v63 = vld [vmem:[#allocation21_spill] sm:$0xff] }
 0x650   : > { %1613 = vmatprep.subr.mxu0 %v3078_v46  ;;  %1684 = vmatprep.subr.mxu1 %v3081_v57  ;;  %v3710_v46 = vld [vmem:[#allocation16_spill] sm:$0xff] }
 0x651   : > { %1614 = vmatpush1.msra.mxu0 %v3084_v52  ;;  %1685 = vmatpush1.msra.mxu1 %v3087_v11  ;;  %v3711_v57 = vld [vmem:[#allocation24_spill] sm:$0xff]  ;;  %v3712_v52 = vld [vmem:[#allocation17_spill] sm:$0xff]  ;;  %v3713_v11 = vld [vmem:[#allocation26_spill] sm:$0xff] }
 0x652   : > { %1615 = vmatprep.subr.mxu0 %v3090_v48  ;;  %1686 = vmatprep.subr.mxu1 %v3093_v55  ;;  %v3714_v48 = vld [vmem:[#allocation18_spill] sm:$0xff]  ;;  %v3715_v55 = vld [vmem:[#allocation28_spill] sm:$0xff] }
 0x653   : > { %1616 = vmatpush1.msra.mxu0 %v3096_v1  ;;  %1687 = vmatpush1.msra.mxu1 %v3099_v2  ;;  %v3716_v1 = vld [vmem:[#allocation19_spill] sm:$0xff]  ;;  %v3717_v2 = vld [vmem:[#allocation30_spill] sm:$0xff] }
 0x654   : > { %1617 = vmatprep.subr.mxu0 %v3102_v3  ;;  %1688 = vmatprep.subr.mxu1 %v3105_v4  ;;  %v3718_v3 = vld [vmem:[#allocation20_spill] sm:$0xff]  ;;  %v3719_v4 = vld [vmem:[#allocation31_spill] sm:$0xff] }
 0x655   : > { %1618 = vmatpush1.msra.mxu0 %v3108_v6  ;;  %1689 = vmatpush1.msra.mxu1 %v3111_v7  ;;  %v3720_v6 = vld [vmem:[#allocation23_spill] sm:$0xff]  ;;  %v3721_v7 = vld [vmem:[#allocation32_spill] sm:$0xff] }
 0x656   : > { %1619 = vmatprep.subr.mxu0 %v3114_v9  ;;  %1690 = vmatprep.subr.mxu1 %v3117_v10  ;;  %v3722_v9 = vld [vmem:[#allocation25_spill] sm:$0xff] }
 0x657   : > { %1620 = vmatpush1.msra.mxu0 %v3120_v12  ;;  %1691 = vmatpush1.msra.mxu1 %v3123_v13  ;;  %v3723_v10 = vld [vmem:[#allocation33_spill] sm:$0xff]  ;;  %v3724_v12 = vld [vmem:[#allocation27_spill] sm:$0xff]  ;;  %v3725_v13 = vld [vmem:[#allocation34_spill] sm:$0xff] }
 0x658   : > { %1621 = vmatprep.subr.mxu0 %v3126_v14  ;;  %1692 = vmatprep.subr.mxu1 %v3129_v15  ;;  %v3726_v14 = vmov 0.0   ;;  %v3727_v15 = vld [vmem:[#allocation29_spill] sm:$0xff] }
 0x659   : > { %1622 = vmatpush1.msra.mxu0 %v3132_v16  ;;  %1693 = vmatpush1.msra.mxu1 %v3135_v17  ;;  %v1944_v16 = vld [vmem:[%s2508_s15 + $0xc0] sm:$0xff] }
 0x65a   : > { %1623 = vmatprep.subr.mxu0 %v3138_v18  ;;  %1694 = vmatprep.subr.mxu1 %v3141_v19  ;;  %v1945_v18 = vld [vmem:[%s2508_s15 + $0xc8] sm:$0xff] }
 0x65b   : > { %1624 = vmatpush1.msra.mxu0 %v3144_v20  ;;  %1695 = vmatpush1.msra.mxu1 %v3147_v21 }
 0x65c   : > { %1625 = vmatprep.subr.mxu0 %v3150_v22  ;;  %1696 = vmatprep.subr.mxu1 %v3153_v24 }
 0x65d   : > { %1626 = vmatpush1.msra.mxu0 %v3156_v27  ;;  %1697 = vmatpush1.msra.mxu1 %v3159_v28  ;;  %v1947_v28 = vld [vmem:[%s2508_s15 + $0xd8] sm:$0xff] }
 0x65e   : > { %1627 = vmatprep.subr.mxu0 %v3162_v29  ;;  %1698 = vmatprep.subr.mxu1 %v3165_v30 }
 0x65f   : > { %1628 = vmatpush1.msra.mxu0 %v3168_v31  ;;  %1699 = vmatpush1.msra.mxu1 %v3171_v32  ;;  %v1946_v31 = vld [vmem:[%s2508_s15 + $0xd0] sm:$0xff] }
 0x660   : > { %1629 = vmatprep.subr.mxu0 %v3174_v33  ;;  %1700 = vmatprep.subr.mxu1 %v3177_v34 }
 0x661   : > { %1630 = vmatpush1.msra.mxu0 %v3180_v35  ;;  %1701 = vmatpush1.msra.mxu1 %v3183_v36 }
 0x662   : > { %1631 = vmatprep.subr.mxu0 %v3186_v37  ;;  %1702 = vmatprep.subr.mxu1 %v3189_v38 }
 0x663   : > { %1632 = vmatpush1.msra.mxu0 %v3192_v39  ;;  %1703 = vmatpush1.msra.mxu1 %v3195_v40 }
 0x664   : > { %1633 = vmatprep.subr.mxu0 %v3198_v41  ;;  %1704 = vmatprep.subr.mxu1 %v3708_v0 }
 0x665   : > { %1634 = vmatpush1.msra.mxu0 %v3709_v63  ;;  %1705 = vmatpush1.msra.mxu1 %v3710_v46  ;;  %v1953_v46 = vld [vmem:[%s2508_s15 + $0xf0] sm:$0xff] }
 0x666   : > { %1635 = vmatprep.subr.mxu0 %v3711_v57  ;;  %1706 = vmatprep.subr.mxu1 %v3712_v52 }
 0x667   : > { %1636 = vmatpush1.msra.mxu0 %v3713_v11  ;;  %1707 = vmatpush1.msra.mxu1 %v3714_v48 }
 0x668   : > { %1637 = vmatprep.subr.mxu0 %v3715_v55  ;;  %1708 = vmatprep.subr.mxu1 %v3716_v1 }
 0x669   : > { %1638 = vmatpush1.msra.mxu0 %v3717_v2  ;;  %1709 = vmatpush1.msra.mxu1 %v3718_v3 }
 0x66a   : > { %1639 = vmatprep.subr.mxu0 %v3719_v4  ;;  %1710 = vmatprep.subr.mxu1 %v3720_v6 }
 0x66b   : > { %1640 = vmatpush1.msra.mxu0 %v3721_v7  ;;  %1711 = vmatpush1.msra.mxu1 %v3722_v9  ;;  %v1787_v7 = vpop.permute.xlu1 %1786 }
 0x66c   : > { %1641 = vmatprep.subr.mxu0 %v3723_v10  ;;  %1712 = vmatprep.subr.mxu1 %v3724_v12  ;;  %vm1788_vm15 = vcmp.eq.s32.totalorder %v1787_v7, 1 }
 0x66d   : > { %1642 = vmatpush1.msra.mxu0 %v3725_v13  ;;  %1675 = vmatprep.mubr.f32.mxu0 %v3726_v14 }
 0x66e   : > { %1713 = vmatpush1.msra.mxu1 %v3727_v15  ;;  %1746 = vmatprep.mubr.f32.mxu1 %v3726_v14 }
 0x70e   : > { %v1492_v17 = vpop.f32.mrf.mxu0  ;;  %v1563_v24 = vpop.f32.mrf.mxu1 }
 0x70f   : > { %v1568_v19 = vadd.f32 %v1944_v16, %v1492_v17  ;;  %v1570_v34 = vadd.f32 %v1946_v31, %v1563_v24 }
 0x710   : > { %v1494_v20 = vpop.f32.mrf.mxu0  ;;  %v1565_v29 = vpop.f32.mrf.mxu1 }
 0x711   : > { %v1948_v21 = vmul.f32 -1.442695, %v1568_v19  ;;  %v1569_v22 = vadd.f32 %v1945_v18, %v1494_v20  ;;  %v1571_v30 = vadd.f32 %v1947_v28, %v1565_v29 }
 0x713   : > { %2140 = vpow2.f32 %v1948_v21  ;;  %v1949_v27 = vmul.f32 -1.442695, %v1569_v22  ;;  %v1950_v32 = vmul.f32 -1.442695, %v1571_v30 }
 0x715   : > { %2142 = vpow2.f32 %v1949_v27 }
 0x716   : > { %2144 = vpow2.f32 %v1950_v32 }
 0x720   : > { %v2141_v33 = vpop.eup %2140 }
 0x721   : > { %v1575_v35 = vadd.f32 1.0, %v2141_v33 }
 0x722   : > { %v2143_v36 = vpop.eup %2142 }
 0x723   : > { %2146 = vrcp.f32 %v1575_v35  ;;  %v1581_v37 = vadd.f32 1.0, %v2143_v36  ;;  %v2145_v38 = vpop.eup %2144 }
 0x724   : > { %2148 = vtanh.f32 %v1570_v34  ;;  %v1588_v23 = vadd.f32 1.0, %v2145_v38 }
 0x725   : > { %2150 = vrcp.f32 %v1581_v37 }
 0x726   : > { %2152 = vrcp.f32 %v1588_v23 }
 0x730   : > { %v2147_v39 = vpop.eup %2146 }
 0x731   : > { %v2149_v40 = vpop.eup %2148 }
 0x732   : > { %v2151_v41 = vpop.eup %2150  ;;  %v1592_v25 = vmul.f32 %v2149_v40, %v2147_v39 }
 0x733   : > { %v1591_v26 = vmul.f32 %v2151_v41, %v3347_v49  ;;  %v2153_v53 = vpop.eup %2152 }
 0x735   : > { %v1593_v43 = vadd.f32 %v1592_v25, %v1591_v26 }
 0x737   : > { %2154 = vtanh.f32 %v1593_v43  ;;  %v1605_v44 = vsel %vm1603_vm14, %v1593_v43, %v3347_v49  ;;  %v1954_v49 = vld [vmem:[%s2508_s15 + $0xf8] sm:$0xff] }
 0x744   : > { %v2155_v50 = vpop.eup %2154 }
 0x745   : > { %v1595_v58 = vmul.f32 %v2155_v50, %v2153_v53 }
 0x747   : > { %v1604_v60 = vsel %vm1603_vm14, %v1595_v58, %v3350_v59 }
 0x748   : > { %1676 = vmatmul.mubr.f32.vlgmr.msra.gmra.mxu0 %v1604_v60  ;;  %1747 = vmatmul.mubr.f32.vlgmr.msra.gmra.mxu1 %v1604_v60 }
 0x808   : > { %v1677_v8 = vpop.f32.mrf.mxu0  ;;  %v1748_v47 = vpop.f32.mrf.mxu1 }
 0x809   : > { %v1753_v56 = vadd.f32 %v1951_v51, %v1677_v8  ;;  %v1755_v52 = vadd.f32 %v1953_v46, %v1748_v47 }
 0x80a   : > { %v1679_v5 = vpop.f32.mrf.mxu0  ;;  %v1750_v0 = vpop.f32.mrf.mxu1 }
 0x80b   : > { %v1955_v62 = vmul.f32 -1.442695, %v1753_v56  ;;  %v1754_v54 = vadd.f32 %v1952_v61, %v1679_v5  ;;  %v1756_v63 = vadd.f32 %v1954_v49, %v1750_v0 }
 0x80d   : > { %2156 = vpow2.f32 %v1955_v62  ;;  %v1956_v45 = vmul.f32 -1.442695, %v1754_v54  ;;  %v1957_v57 = vmul.f32 -1.442695, %v1756_v63 }
 0x80f   : > { %2158 = vpow2.f32 %v1956_v45 }
 0x810   : > { %2160 = vpow2.f32 %v1957_v57 }
 0x81a   : > { %v2157_v59 = vpop.eup %2156 }
 0x81b   : > { %v1760_v11 = vadd.f32 1.0, %v2157_v59 }
 0x81c   : > { %v2159_v48 = vpop.eup %2158 }
 0x81d   : > { %2162 = vrcp.f32 %v1760_v11  ;;  %v1766_v55 = vadd.f32 1.0, %v2159_v48  ;;  %v2161_v1 = vpop.eup %2160 }
 0x81e   : > { %2164 = vtanh.f32 %v1755_v52  ;;  %v1773_v6 = vadd.f32 1.0, %v2161_v1 }
 0x81f   : > { %2166 = vrcp.f32 %v1766_v55 }
 0x820   : > { %2168 = vrcp.f32 %v1773_v6 }
 0x82a   : > { %v2163_v2 = vpop.eup %2162 }
 0x82b   : > { %v2165_v3 = vpop.eup %2164 }
 0x82c   : > { %v2167_v4 = vpop.eup %2166  ;;  %v1777_v9 = vmul.f32 %v2165_v3, %v2163_v2 }
 0x82d   : > { %v1776_v10 = vmul.f32 %v2167_v4, %v1605_v44  ;;  %v2169_v14 = vpop.eup %2168 }
 0x82f   : > { %v1778_v12 = vadd.f32 %v1777_v9, %v1776_v10 }
 0x831   : > { %2170 = vtanh.f32 %v1778_v12  ;;  %v1790_v13 = vsel %vm1788_vm15, %v1778_v12, %v1605_v44 }
 0x832   : > { %1792 = vst [vmem:[#allocation2] sm:$0xff] %v1790_v13 }
 0x83e   : > { %v2171_v15 = vpop.eup %2170 }
 0x83f   : > { %v1780_v16 = vmul.f32 %v2171_v15, %v2169_v14 }
 0x841   : > { %v1789_v17 = vsel %vm1788_vm15, %v1780_v16, %v1604_v60 }
 0x842   : > { %1791 = vst [vmem:[#allocation10] sm:$0xff] %v1789_v17 }
 0x843 PF: > { %p3431_p1 = scmp.eq.s32.totalorder %s1891_s0, 1  ;;  %s2381_s7 = smov [#allocation10]  }
 0x844   : > { %s1802_s8 = sshll.u32 %s2381_s7, 4  ;;  %s1803_s8 = int_to_ptr.vmem [resolvable:$true] %s1802_s8 }
 0x845   : > { %s2290_s9 = scalar_lea.vmem %s1803_s8, 128  ;;  %p2297_p12 = scmp.lt.s32.totalorder %s1803_s8, %s1803_s8 }
 0x846   : > { %p2291_p4 = scmp.ne.s32.totalorder %s1803_s8, %s2290_s9  ;;  %p2298_p13 = scmp.lt.s32.totalorder %s2290_s9, %s2290_s9 }
 0x848   : > { %p2292_p11 = pnand %p2291_p4, %p3431_p1  ;;  %p2299_p0 = por %p2298_p13, %p2297_p12 }
 0x84a   : > { %p2293_p7 = pneg %p2292_p11 }
 0x84c   : > { %p2300_p2 = pnand %p2299_p0, %p2293_p7 }
 0x84e   : > { %2303 = shalt.err (!%p2300_p2)
}
 0x84f   : > { %1971 = dma.vmem_to_hbm [thread:$0]  (%p3431_p1), %s1803_s8, 128, %s3468_s4, [#allocation7]  }
 0x850   : > { %2347 = dma.done.wait (%p3431_p1), [#allocation7], 128  }
 0x851   : > { %2349 = vsyncadd (%p3431_p1), [#allocation7], 4294967168 }
 0x852 PF: > { %s20_s22 = sadd.s32 1, %s2372_s22   ;;  %s3729_s17 = smov %s2356_s18 }
 0x853   : > { %p17_p3 = scmp.ge.s32.totalorder %s20_s22, 4   ;;  %s3730_s18 = smov %s2360_s19 }
 0x854   : > { %s3731_s19 = smov %s2489_s14  ;;  %s3732_s20 = smov %s2368_s21 }
 0x855   : > { %s3733_s21 = smov %s3735_s29  ;;  %19 = sbr.rel (!%p17_p3) target bundleno = 8 (0x8), region = 92 }
 0x85a   :  { %1815 = vsyncpa [#allocation6], 1 }
 0x85b   :  { %1817 = vsyncpa [#allocation6 + $0x1], 1 }
 0x85c   :  { %1818 = vsyncpa [#allocation9], 1 }
 0x85d   :  { %1819 = vsyncpa [#allocation7], 1 }
 0x85e   :  { %1821 = vsyncpa [#allocation7 + $0x1], 1 }

</bundles_post_ra>
